<compile_context>
chip_gen: v6e
topology: v6e:2x2x1
jax: 0.10.0
libtpu: 0.0.40
codegen_flags: <defaults>
</compile_context>

<pallas_src>
import jax
import jax.numpy as jnp
from jax.experimental import pallas as pl
from jax.experimental.pallas import tpu as pltpu


def _ceil_to(v, m):
    return (v + m - 1) // m * m


def make_shelf_block_kernel(L, offs, base, has_conv0):
    """L         : lanes per grid step (nb images * Lslot, multiple of 128)
       offs      : the 9 flattened 3x3 tap offsets (kh*(W+4) + kw)
       base      : frame offset of intermediate buffers vs the padded-input frame
       has_conv0 : whether the in_planes != planes projection conv exists
    """

    def conv3x3(buf, w_ref, b_ref, frame_base):
        # buf: (C, L) f32 activation slab living in frame `frame_base`.
        # Each tap is a static lane-roll (XLU slot, ~free); the 9 shifted
        # copies are stacked along sublanes so the whole 3x3 conv is ONE bf16
        # MXU matmul with K = 9*C, accumulated in f32.
        shifts = [(frame_base - o) % L for o in offs]
        pieces = [buf if s == 0 else pltpu.roll(buf, s, axis=1) for s in shifts]
        patches = jnp.concatenate(pieces, axis=0).astype(jnp.bfloat16)
        acc = jnp.dot(w_ref[...], patches, preferred_element_type=jnp.float32)
        return acc + b_ref[...]                     # + per-channel bias (C,1)

    def tail(x_act, mask, w1a_ref, b1a_ref, w1b_ref, b1b_ref, out_ref):
        # conv1 + bn1 (folded into w1a/b1a) + relu1
        h = jnp.maximum(conv3x3(x_act, w1a_ref, b1a_ref, base), 0.0) * mask
        # TODO(synk): nn.Dropout2d is identity in eval mode; training-mode
        # per-channel dropout (RNG masking) is not implemented here.
        # conv1 (SAME weights, 2nd use) + bn2 (folded into w1b/b1b)
        h2 = conv3x3(h, w1b_ref, b1b_ref, base)
        out_ref[0] = jnp.maximum(h2 + x_act, 0.0).astype(out_ref.dtype)

    if has_conv0:
        def kernel(x_ref, m_ref, w0_ref, b0_ref,
                   w1a_ref, b1a_ref, w1b_ref, b1b_ref, out_ref):
            mask = m_ref[...]                 # (1, L): 1 on real output pixels
            x = x_ref[0]                      # (Cin_p, L) padded-frame input
            x_act = jnp.maximum(conv3x3(x, w0_ref, b0_ref, 0), 0.0) * mask
            tail(x_act, mask, w1a_ref, b1a_ref, w1b_ref, b1b_ref, out_ref)
    else:
        def kernel(x_ref, m_ref,
                   w1a_ref, b1a_ref, w1b_ref, b1b_ref, out_ref):
            mask = m_ref[...]
            x = x_ref[0]
            # No conv0: re-frame the raw input into the intermediate frame so
            # it serves both as conv1's input and as the residual branch.
            x_act = pltpu.roll(x, (L - base) % L, axis=1) * mask
            tail(x_act, mask, w1a_ref, b1a_ref, w1b_ref, b1b_ref, out_ref)

    return kernel


def shelf_block_forward(x_nchw, w0, b0, w1, b1, s1, t1, s2, t2,
                        images_per_step=None):
    """Fused ShelfBlock forward.  x_nchw: (N, Cin, H, W) f32, weights HWIO.
       s1/t1, s2/t2 are the eval-mode BatchNorm scale/shift (folded on host)."""
    N, Cin, H, W = x_nchw.shape
    Cout = w1.shape[-1]
    has_conv0 = (Cin != Cout)

    Cin_p = _ceil_to(Cin, 8)
    Cout_p = _ceil_to(Cout, 8)
    W4 = W + 4                       # padded row stride (1 left / 3 right pad)
    FRAME = H * W4                   # flattened output frame per image
    PAD_FRAME = (H + 2) * W4         # flattened padded-input frame
    BASE = W4 + 1                    # frame shift of intermediates vs. input
    # Per-image lane slot: holds the padded frame, leaves a zero tail >= BASE,
    # and is a multiple of 128 so every slot (and the output) is lane-aligned.
    Lslot = _ceil_to(max(PAD_FRAME, FRAME + BASE), 128)

    if images_per_step is None:
        images_per_step = 1
        for cand in (8, 4, 2):          # pack images per step, but keep the
            if N % cand == 0 and N // cand >= 2:   # grid >= 2 (v7x: 2 TCs)
                images_per_step = cand
                break
    nb = images_per_step
    assert N % nb == 0
    G = N // nb
    L = nb * Lslot

    # ---------------- host-side packing (layout plumbing only) -------------
    f32 = jnp.float32
    xc = jnp.zeros((N, Cin_p, H, W), f32).at[:, :Cin].set(x_nchw.astype(f32))
    xp = jnp.pad(xc, ((0, 0), (0, 0), (1, 1), (1, 3)))       # (N,Cp,H+2,W+4)
    xf = jnp.pad(xp.reshape(N, Cin_p, PAD_FRAME),
                 ((0, 0), (0, 0), (0, Lslot - PAD_FRAME)))   # (N,Cp,Lslot)
    xg = (xf.reshape(G, nb, Cin_p, Lslot)
            .transpose(0, 2, 1, 3)
            .reshape(G, Cin_p, L))                           # images on lanes

    def pack_w(w, Ci, Co):   # (3,3,Ci,Co) -> (Co_p, 9*Ci_p) bf16, tap-major K
        Ci_p, Co_p = _ceil_to(Ci, 8), _ceil_to(Co, 8)
        wp = jnp.zeros((3, 3, Ci_p, Co_p), f32).at[:, :, :Ci, :Co].set(w)
        return (jnp.transpose(wp, (3, 0, 1, 2))
                .reshape(Co_p, 9 * Ci_p).astype(jnp.bfloat16))

    def pack_vec(v):          # (Cout,) -> (Cout_p, 1) f32 column
        return jnp.zeros((Cout_p, 1), f32).at[:Cout, 0].set(v)

    # Fold BatchNorm into the two uses of the SHARED conv1 weight:
    w1a = pack_w(w1 * s1, Cout, Cout)          # conv1 + bn1 scale
    w1b = pack_w(w1 * s2, Cout, Cout)          # conv1 + bn2 scale
    b1a = pack_vec(s1 * b1 + t1)               # conv1 bias + bn1 shift
    b1b = pack_vec(s2 * b1 + t2)               # conv1 bias + bn2 shift

    # Validity mask: 1 on real pixels of each image slot, 0 on the per-row
    # garbage columns (w >= W) and the zero tail.
    pcol = jnp.arange(Lslot, dtype=jnp.int32)
    m_slot = ((pcol < FRAME) & ((pcol % W4) < W)).astype(f32)
    mask = jnp.tile(m_slot, nb).reshape(1, L)

    offs = tuple(kh * W4 + kw for kh in range(3) for kw in range(3))
    kernel = make_shelf_block_kernel(L, offs, BASE, has_conv0)

    const = lambda g: (0, 0)
    operands = [xg, mask]
    in_specs = [
        pl.BlockSpec((1, Cin_p, L), lambda g: (g, 0, 0)),    # input slab
        pl.BlockSpec((1, L), const),                         # validity mask
    ]
    if has_conv0:
        operands += [pack_w(w0, Cin, Cout), pack_vec(b0)]
        in_specs += [pl.BlockSpec((Cout_p, 9 * Cin_p), const),   # conv0 W
                     pl.BlockSpec((Cout_p, 1), const)]           # conv0 b
    operands += [w1a, b1a, w1b, b1b]
    in_specs += [pl.BlockSpec((Cout_p, 9 * Cout_p), const),      # conv1*bn1 W
                 pl.BlockSpec((Cout_p, 1), const),               # fused bias 1
                 pl.BlockSpec((Cout_p, 9 * Cout_p), const),      # conv1*bn2 W
                 pl.BlockSpec((Cout_p, 1), const)]               # fused bias 2

    conv0_flops = 2 * 9 * Cin_p * Cout_p if has_conv0 else 0
    flops = N * Lslot * (conv0_flops + 2 * 2 * 9 * Cout_p * Cout_p)
    bytes_accessed = 4 * (xg.size + G * Cout_p * L) + 2 * (w1a.size + w1b.size)

    out_flat = pl.pallas_call(
        kernel,
        out_shape=jax.ShapeDtypeStruct((G, Cout_p, L), f32),
        grid_spec=pltpu.PrefetchScalarGridSpec(
            num_scalar_prefetch=0,
            grid=(G,),
            in_specs=in_specs,
            out_specs=pl.BlockSpec((1, Cout_p, L), lambda g: (g, 0, 0)),
        ),
        compiler_params=pltpu.CompilerParams(
            dimension_semantics=("parallel",)),
        cost_estimate=pl.CostEstimate(
            flops=int(flops), transcendentals=0,
            bytes_accessed=int(bytes_accessed)),
    )(*operands)

    # Un-pack: (G, Cout_p, nb*Lslot) -> NCHW.  Pure layout plumbing in XLA.
    out = (out_flat.reshape(G, Cout_p, nb, Lslot)
           .transpose(0, 2, 1, 3)
           .reshape(N, Cout_p, Lslot))
    out = out[:, :Cout, :FRAME].reshape(N, Cout, H, W4)[..., :W]
    return out


def shelf_block_reference(x_nchw, w0, b0, w1, b1, s1, t1, s2, t2):
    """Pure-JAX (XLA) reference of the same forward, for verification."""
    Cin = x_nchw.shape[1]
    Cout = w1.shape[-1]
    x = jnp.transpose(x_nchw, (0, 2, 3, 1))

    def conv(z, w, b):
        y = jax.lax.conv_general_dilated(
            z, w, (1, 1), 'SAME',
            dimension_numbers=('NHWC', 'HWIO', 'NHWC'),
            precision=jax.lax.Precision.HIGHEST)
        return y + b

    if Cin != Cout:
        x = jax.nn.relu(conv(x, w0, b0))
    out = jax.nn.relu(conv(x, w1, b1) * s1 + t1)
    out = conv(out, w1, b1) * s2 + t2
    out = jax.nn.relu(out + x)
    return jnp.transpose(out, (0, 3, 1, 2))


if __name__ == "__main__":
    H = W = 16
    eps = 1e-5

    def bn_fold(kg, kb, km, kv, C):
        gamma = 1.0 + 0.1 * jax.random.normal(kg, (C,), jnp.float32)
        beta = 0.1 * jax.random.normal(kb, (C,), jnp.float32)
        mean = 0.1 * jax.random.normal(km, (C,), jnp.float32)
        var = 1.0 + 0.1 * jnp.abs(jax.random.normal(kv, (C,), jnp.float32))
        scale = gamma / jnp.sqrt(var + eps)
        shift = beta - mean * scale
        return scale, shift

    def run_case(seed, N, Cin, Cout):
        keys = jax.random.split(jax.random.PRNGKey(seed), 13)
        x = jax.random.normal(keys[0], (N, Cin, H, W), jnp.float32)
        # conv0: Conv2d(in_planes, planes, 3, pad=1, bias=True) (only if Cin!=Cout)
        w0 = 0.1 * jax.random.normal(keys[1], (3, 3, Cin, Cout), jnp.float32)
        b0 = 0.1 * jax.random.normal(keys[2], (Cout,), jnp.float32)
        # conv1: Conv2d(planes, planes, 3, pad=1, bias=True) -- shared, used twice
        w1 = 0.1 * jax.random.normal(keys[3], (3, 3, Cout, Cout), jnp.float32)
        b1 = 0.1 * jax.random.normal(keys[4], (Cout,), jnp.float32)
        s1, t1 = bn_fold(keys[5], keys[6], keys[7], keys[8], Cout)
        s2, t2 = bn_fold(keys[9], keys[10], keys[11], keys[12], Cout)

        out = shelf_block_forward(x, w0, b0, w1, b1, s1, t1, s2, t2)
        out = jax.block_until_ready(out)
        ref = shelf_block_reference(x, w0, b0, w1, b1, s1, t1, s2, t2)
        assert out.shape == (N, Cout, H, W)
        err = float(jnp.max(jnp.abs(out - ref)))
        assert jnp.allclose(out, ref, atol=3e-2, rtol=3e-2), err

    # in_planes != planes -> conv0 projection path.  N=4 so the wrapper packs
    # 2 images per grid step AND keeps 2 grid steps (both v7x cores get work).
    run_case(0, 4, 4, 8)
    # in_planes == planes -> identity-residual path (no conv0 operands passed).
    run_case(1, 2, 8, 8)

    print("KERNEL_OK")
</pallas_src>

<mosaic_0001>
module attributes {stable_mosaic.version = 11 : i64} {
  func.func @kernel(%arg0: i32, %arg1: memref<1x8x768xf32, #tpu.memory_space<vmem>>, %arg2: memref<1x768xf32, #tpu.memory_space<vmem>>, %arg3: memref<8x72xbf16, #tpu.memory_space<vmem>>, %arg4: memref<8x1xf32, #tpu.memory_space<vmem>>, %arg5: memref<8x72xbf16, #tpu.memory_space<vmem>>, %arg6: memref<8x1xf32, #tpu.memory_space<vmem>>, %arg7: memref<8x72xbf16, #tpu.memory_space<vmem>>, %arg8: memref<8x1xf32, #tpu.memory_space<vmem>>, %arg9: memref<1x8x768xf32, #tpu.memory_space<vmem>>) attributes {dimension_semantics = [#tpu.dimension_semantics<parallel>], iteration_bounds = array<i64: 2>, scalar_prefetch = 0 : i64, scratch_operands = 0 : i64, tpu.core_type = #tpu.core_type<tc>, window_params = [{transform_indices = @transform_0, window_bounds = array<i64: 1, 8, 768>}, {pipeline_mode = #tpu.pipeline_mode<synchronous>, transform_indices = @transform_1, window_bounds = array<i64: 1, 768>}, {pipeline_mode = #tpu.pipeline_mode<synchronous>, transform_indices = @transform_2, window_bounds = array<i64: 8, 72>}, {pipeline_mode = #tpu.pipeline_mode<synchronous>, transform_indices = @transform_3, window_bounds = array<i64: 8, 1>}, {pipeline_mode = #tpu.pipeline_mode<synchronous>, transform_indices = @transform_4, window_bounds = array<i64: 8, 72>}, {pipeline_mode = #tpu.pipeline_mode<synchronous>, transform_indices = @transform_5, window_bounds = array<i64: 8, 1>}, {pipeline_mode = #tpu.pipeline_mode<synchronous>, transform_indices = @transform_6, window_bounds = array<i64: 8, 72>}, {pipeline_mode = #tpu.pipeline_mode<synchronous>, transform_indices = @transform_7, window_bounds = array<i64: 8, 1>}, {transform_indices = @transform_8, window_bounds = array<i64: 1, 8, 768>}]} {
    %c0 = arith.constant 0 : index
    %c0_0 = arith.constant 0 : index
    %0 = vector.load %arg2[%c0, %c0_0] : memref<1x768xf32, #tpu.memory_space<vmem>>, vector<1x768xf32>
    %c0_1 = arith.constant 0 : index
    %c0_2 = arith.constant 0 : index
    %c0_3 = arith.constant 0 : index
    %1 = vector.load %arg1[%c0_1, %c0_2, %c0_3] : memref<1x8x768xf32, #tpu.memory_space<vmem>>, vector<1x8x768xf32>
    %2 = vector.shape_cast %1 : vector<1x8x768xf32> to vector<8x768xf32>
    %c767_i32 = arith.constant 767 : i32
    %3 = tpu.dynamic_rotate %2 by %c767_i32 dim 1 : vector<8x768xf32>, i32 -> vector<8x768xf32>
    %c766_i32 = arith.constant 766 : i32
    %4 = tpu.dynamic_rotate %2 by %c766_i32 dim 1 : vector<8x768xf32>, i32 -> vector<8x768xf32>
    %c748_i32 = arith.constant 748 : i32
    %5 = tpu.dynamic_rotate %2 by %c748_i32 dim 1 : vector<8x768xf32>, i32 -> vector<8x768xf32>
    %c747_i32 = arith.constant 747 : i32
    %6 = tpu.dynamic_rotate %2 by %c747_i32 dim 1 : vector<8x768xf32>, i32 -> vector<8x768xf32>
    %c746_i32 = arith.constant 746 : i32
    %7 = tpu.dynamic_rotate %2 by %c746_i32 dim 1 : vector<8x768xf32>, i32 -> vector<8x768xf32>
    %c728_i32 = arith.constant 728 : i32
    %8 = tpu.dynamic_rotate %2 by %c728_i32 dim 1 : vector<8x768xf32>, i32 -> vector<8x768xf32>
    %c727_i32 = arith.constant 727 : i32
    %9 = tpu.dynamic_rotate %2 by %c727_i32 dim 1 : vector<8x768xf32>, i32 -> vector<8x768xf32>
    %c726_i32 = arith.constant 726 : i32
    %10 = tpu.dynamic_rotate %2 by %c726_i32 dim 1 : vector<8x768xf32>, i32 -> vector<8x768xf32>
    %11 = tpu.concatenate %2, %3, %4, %5, %6, %7, %8, %9, %10 in 0 : vector<8x768xf32>, vector<8x768xf32>, vector<8x768xf32>, vector<8x768xf32>, vector<8x768xf32>, vector<8x768xf32>, vector<8x768xf32>, vector<8x768xf32>, vector<8x768xf32> -> vector<72x768xf32>
    %12 = arith.truncf %11 : vector<72x768xf32> to vector<72x768xbf16>
    %c0_4 = arith.constant 0 : index
    %c0_5 = arith.constant 0 : index
    %13 = vector.load %arg3[%c0_4, %c0_5] : memref<8x72xbf16, #tpu.memory_space<vmem>>, vector<8x72xbf16>
    %cst = arith.constant dense<0.000000e+00> : vector<8x768xf32>
    %14 = tpu.matmul %13, %12, %cst {dimension_numbers = #tpu.dot_dimension_numbers<[1], [0], [0], [1], [0, 0, 1, 1], [], []>} : vector<8x72xbf16>, vector<72x768xbf16>, vector<8x768xf32> -> vector<8x768xf32>
    %c0_6 = arith.constant 0 : index
    %c0_7 = arith.constant 0 : index
    %15 = vector.load %arg4[%c0_6, %c0_7] : memref<8x1xf32, #tpu.memory_space<vmem>>, vector<8x1xf32>
    %16 = vector.broadcast %15 : vector<8x1xf32> to vector<8x768xf32>
    %17 = arith.addf %14, %16 : vector<8x768xf32>
    %cst_8 = arith.constant 0.000000e+00 : f32
    %18 = vector.broadcast %cst_8 : f32 to vector<8x768xf32>
    %19 = arith.maximumf %17, %18 : vector<8x768xf32>
    %20 = vector.broadcast %0 : vector<1x768xf32> to vector<8x768xf32>
    %21 = arith.mulf %19, %20 : vector<8x768xf32>
    %c21_i32 = arith.constant 21 : i32
    %22 = tpu.dynamic_rotate %21 by %c21_i32 dim 1 : vector<8x768xf32>, i32 -> vector<8x768xf32>
    %c20_i32 = arith.constant 20 : i32
    %23 = tpu.dynamic_rotate %21 by %c20_i32 dim 1 : vector<8x768xf32>, i32 -> vector<8x768xf32>
    %c19_i32 = arith.constant 19 : i32
    %24 = tpu.dynamic_rotate %21 by %c19_i32 dim 1 : vector<8x768xf32>, i32 -> vector<8x768xf32>
    %c1_i32 = arith.constant 1 : i32
    %25 = tpu.dynamic_rotate %21 by %c1_i32 dim 1 : vector<8x768xf32>, i32 -> vector<8x768xf32>
    %c767_i32_9 = arith.constant 767 : i32
    %26 = tpu.dynamic_rotate %21 by %c767_i32_9 dim 1 : vector<8x768xf32>, i32 -> vector<8x768xf32>
    %c749_i32 = arith.constant 749 : i32
    %27 = tpu.dynamic_rotate %21 by %c749_i32 dim 1 : vector<8x768xf32>, i32 -> vector<8x768xf32>
    %c748_i32_10 = arith.constant 748 : i32
    %28 = tpu.dynamic_rotate %21 by %c748_i32_10 dim 1 : vector<8x768xf32>, i32 -> vector<8x768xf32>
    %c747_i32_11 = arith.constant 747 : i32
    %29 = tpu.dynamic_rotate %21 by %c747_i32_11 dim 1 : vector<8x768xf32>, i32 -> vector<8x768xf32>
    %30 = tpu.concatenate %22, %23, %24, %25, %21, %26, %27, %28, %29 in 0 : vector<8x768xf32>, vector<8x768xf32>, vector<8x768xf32>, vector<8x768xf32>, vector<8x768xf32>, vector<8x768xf32>, vector<8x768xf32>, vector<8x768xf32>, vector<8x768xf32> -> vector<72x768xf32>
    %31 = arith.truncf %30 : vector<72x768xf32> to vector<72x768xbf16>
    %c0_12 = arith.constant 0 : index
    %c0_13 = arith.constant 0 : index
    %32 = vector.load %arg5[%c0_12, %c0_13] : memref<8x72xbf16, #tpu.memory_space<vmem>>, vector<8x72xbf16>
    %cst_14 = arith.constant dense<0.000000e+00> : vector<8x768xf32>
    %33 = tpu.matmul %32, %31, %cst_14 {dimension_numbers = #tpu.dot_dimension_numbers<[1], [0], [0], [1], [0, 0, 1, 1], [], []>} : vector<8x72xbf16>, vector<72x768xbf16>, vector<8x768xf32> -> vector<8x768xf32>
    %c0_15 = arith.constant 0 : index
    %c0_16 = arith.constant 0 : index
    %34 = vector.load %arg6[%c0_15, %c0_16] : memref<8x1xf32, #tpu.memory_space<vmem>>, vector<8x1xf32>
    %35 = vector.broadcast %34 : vector<8x1xf32> to vector<8x768xf32>
    %36 = arith.addf %33, %35 : vector<8x768xf32>
    %cst_17 = arith.constant 0.000000e+00 : f32
    %37 = vector.broadcast %cst_17 : f32 to vector<8x768xf32>
    %38 = arith.maximumf %36, %37 : vector<8x768xf32>
    %39 = vector.broadcast %0 : vector<1x768xf32> to vector<8x768xf32>
    %40 = arith.mulf %38, %39 : vector<8x768xf32>
    %c21_i32_18 = arith.constant 21 : i32
    %41 = tpu.dynamic_rotate %40 by %c21_i32_18 dim 1 : vector<8x768xf32>, i32 -> vector<8x768xf32>
    %c20_i32_19 = arith.constant 20 : i32
    %42 = tpu.dynamic_rotate %40 by %c20_i32_19 dim 1 : vector<8x768xf32>, i32 -> vector<8x768xf32>
    %c19_i32_20 = arith.constant 19 : i32
    %43 = tpu.dynamic_rotate %40 by %c19_i32_20 dim 1 : vector<8x768xf32>, i32 -> vector<8x768xf32>
    %c1_i32_21 = arith.constant 1 : i32
    %44 = tpu.dynamic_rotate %40 by %c1_i32_21 dim 1 : vector<8x768xf32>, i32 -> vector<8x768xf32>
    %c767_i32_22 = arith.constant 767 : i32
    %45 = tpu.dynamic_rotate %40 by %c767_i32_22 dim 1 : vector<8x768xf32>, i32 -> vector<8x768xf32>
    %c749_i32_23 = arith.constant 749 : i32
    %46 = tpu.dynamic_rotate %40 by %c749_i32_23 dim 1 : vector<8x768xf32>, i32 -> vector<8x768xf32>
    %c748_i32_24 = arith.constant 748 : i32
    %47 = tpu.dynamic_rotate %40 by %c748_i32_24 dim 1 : vector<8x768xf32>, i32 -> vector<8x768xf32>
    %c747_i32_25 = arith.constant 747 : i32
    %48 = tpu.dynamic_rotate %40 by %c747_i32_25 dim 1 : vector<8x768xf32>, i32 -> vector<8x768xf32>
    %49 = tpu.concatenate %41, %42, %43, %44, %40, %45, %46, %47, %48 in 0 : vector<8x768xf32>, vector<8x768xf32>, vector<8x768xf32>, vector<8x768xf32>, vector<8x768xf32>, vector<8x768xf32>, vector<8x768xf32>, vector<8x768xf32>, vector<8x768xf32> -> vector<72x768xf32>
    %50 = arith.truncf %49 : vector<72x768xf32> to vector<72x768xbf16>
    %c0_26 = arith.constant 0 : index
    %c0_27 = arith.constant 0 : index
    %51 = vector.load %arg7[%c0_26, %c0_27] : memref<8x72xbf16, #tpu.memory_space<vmem>>, vector<8x72xbf16>
    %cst_28 = arith.constant dense<0.000000e+00> : vector<8x768xf32>
    %52 = tpu.matmul %51, %50, %cst_28 {dimension_numbers = #tpu.dot_dimension_numbers<[1], [0], [0], [1], [0, 0, 1, 1], [], []>} : vector<8x72xbf16>, vector<72x768xbf16>, vector<8x768xf32> -> vector<8x768xf32>
    %c0_29 = arith.constant 0 : index
    %c0_30 = arith.constant 0 : index
    %53 = vector.load %arg8[%c0_29, %c0_30] : memref<8x1xf32, #tpu.memory_space<vmem>>, vector<8x1xf32>
    %54 = vector.broadcast %53 : vector<8x1xf32> to vector<8x768xf32>
    %55 = arith.addf %52, %54 : vector<8x768xf32>
    %56 = arith.addf %55, %21 : vector<8x768xf32>
    %cst_31 = arith.constant 0.000000e+00 : f32
    %57 = vector.broadcast %cst_31 : f32 to vector<8x768xf32>
    %58 = arith.maximumf %56, %57 : vector<8x768xf32>
    %c0_32 = arith.constant 0 : index
    %c0_33 = arith.constant 0 : index
    %c0_34 = arith.constant 0 : index
    %59 = vector.load %arg9[%c0_32, %c0_33, %c0_34] : memref<1x8x768xf32, #tpu.memory_space<vmem>>, vector<1x8x768xf32>
    %60 = vector.shape_cast %59 : vector<1x8x768xf32> to vector<8x768xf32>
    %61 = vector.shape_cast %58 : vector<8x768xf32> to vector<1x8x768xf32>
    tpu.vector_store %arg9[%c0_32, %c0_33, %c0_34], %61 {strides = array<i32>} : memref<1x8x768xf32, #tpu.memory_space<vmem>>, vector<1x8x768xf32>,
    return
  }
  func.func @transform_0(%arg0: i32) -> (i32, i32, i32) {
    %c0_i32 = arith.constant 0 : i32
    %c0_i32_0 = arith.constant 0 : i32
    %c0_i32_1 = arith.constant 0 : i32
    return %arg0, %c0_i32, %c0_i32_0 : i32, i32, i32
  }
  func.func @transform_1(%arg0: i32) -> (i32, i32) {
    %c0_i32 = arith.constant 0 : i32
    %c0_i32_0 = arith.constant 0 : i32
    %c0_i32_1 = arith.constant 0 : i32
    return %c0_i32, %c0_i32_0 : i32, i32
  }
  func.func @transform_2(%arg0: i32) -> (i32, i32) {
    %c0_i32 = arith.constant 0 : i32
    %c0_i32_0 = arith.constant 0 : i32
    %c0_i32_1 = arith.constant 0 : i32
    return %c0_i32, %c0_i32_0 : i32, i32
  }
  func.func @transform_3(%arg0: i32) -> (i32, i32) {
    %c0_i32 = arith.constant 0 : i32
    %c0_i32_0 = arith.constant 0 : i32
    %c0_i32_1 = arith.constant 0 : i32
    return %c0_i32, %c0_i32_0 : i32, i32
  }
  func.func @transform_4(%arg0: i32) -> (i32, i32) {
    %c0_i32 = arith.constant 0 : i32
    %c0_i32_0 = arith.constant 0 : i32
    %c0_i32_1 = arith.constant 0 : i32
    return %c0_i32, %c0_i32_0 : i32, i32
  }
  func.func @transform_5(%arg0: i32) -> (i32, i32) {
    %c0_i32 = arith.constant 0 : i32
    %c0_i32_0 = arith.constant 0 : i32
    %c0_i32_1 = arith.constant 0 : i32
    return %c0_i32, %c0_i32_0 : i32, i32
  }
  func.func @transform_6(%arg0: i32) -> (i32, i32) {
    %c0_i32 = arith.constant 0 : i32
    %c0_i32_0 = arith.constant 0 : i32
    %c0_i32_1 = arith.constant 0 : i32
    return %c0_i32, %c0_i32_0 : i32, i32
  }
  func.func @transform_7(%arg0: i32) -> (i32, i32) {
    %c0_i32 = arith.constant 0 : i32
    %c0_i32_0 = arith.constant 0 : i32
    %c0_i32_1 = arith.constant 0 : i32
    return %c0_i32, %c0_i32_0 : i32, i32
  }
  func.func @transform_8(%arg0: i32) -> (i32, i32, i32) {
    %c0_i32 = arith.constant 0 : i32
    %c0_i32_0 = arith.constant 0 : i32
    %c0_i32_1 = arith.constant 0 : i32
    return %arg0, %c0_i32, %c0_i32_0 : i32, i32, i32
  }
}

</mosaic_0001>

<bundles_post_ra>
// kernel: tpu_custom_call.1
= control target key start
LH: loop header
LB: loop body
LE: loop exit
PB: predicated region body
PF: predicated region fallthrough
CT: control target
= control target key end

     0   :  { %13 = vsyncpa [#allocation3], 0  ;;  %s3128_s0 = inlined_call_operand.hbm [shape: f32[2,8,768], index: 0, kind: input, shape index: {}]   ;;  %s3129_s1 = inlined_call_operand.vmem [shape: f32[1,768], index: 1, kind: input, shape index: {}]   ;;  %s3130_s2 = inlined_call_operand.vmem [shape: bf16[8,72], index: 2, kind: input, shape index: {}]   ;;  %s3131_s3 = inlined_call_operand.vmem [shape: f32[8,1], index: 3, kind: input, shape index: {}]   ;;  %s3132_s4 = inlined_call_operand.vmem [shape: bf16[8,72], index: 4, kind: input, shape index: {}]   ;;  %s3133_s5 = inlined_call_operand.vmem [shape: f32[8,1], index: 5, kind: input, shape index: {}]   ;;  %s3134_s6 = inlined_call_operand.vmem [shape: bf16[8,72], index: 6, kind: input, shape index: {}]   ;;  %s3135_s7 = inlined_call_operand.vmem [shape: f32[8,1], index: 7, kind: input, shape index: {}]   ;;  %s3136_s8 = inlined_call_operand.hbm [shape: f32[2,8,768], index: 8, kind: output, shape index: {}]  }
   0x1   :  { %15 = vsyncpa [#allocation3 + $0x1], 0 }
   0x2   :  { %16 = vsyncpa [#allocation4], 0 }
   0x3   :  { %18 = vsyncpa [#allocation4 + $0x1], 0  ;;  %s2002_s27 = smov 0   ;;  %s2004_s28 = smov 0  }
   0x4   :  { %s2006_s29 = smov 0   ;;  %s2008_s30 = smov 0  }
   0x5 LB: > { %3140 = sst [smem:[#allocation8_spill]] %s1935_s29  ;;  %s2023_s9 = sadd.s32 4294967295, %s1939_s30   ;;  %s1939_s30 = sphi %s2008_s30, %s3156_s30   ;;  %s1935_s29 = sphi %s2006_s29, %s3153_s29   ;;  %s1931_s28 = sphi %s2004_s28, %s3155_s28   ;;  %s1927_s27 = sphi %s2002_s27, %s3154_s27  }
   0x6   : > { %s1480_s10 = sadd.s32 4294967294, %s1939_s30   ;;  %s2027_s11 = sadd.s32 1, %s1939_s30  }
   0x7   : > { %s31_s12 = sadd.s32 1, %s1935_s29  ;;  %s28_s13 = ssub.s32 %s1939_s30, %s2027_s11 }
   0x8   : > { %p38_p0 = scmp.ne.s32.totalorder %s1935_s29, %s1931_s28  ;;  %p29_p1 = scmp.eq.s32.totalorder %s28_s13, 0 }
   0x9   : > { %p39_p2 = scmp.eq.s32.totalorder %s1939_s30, 0  ;;  %p44_p3 = scmp.ne.s32.totalorder %s1931_s28, %s1927_s27 }
   0xa   : > { %p45_p4 = scmp.eq.s32.totalorder %s2023_s9, 0  ;;  %p215_p7 = scmp.eq.s32.totalorder %s2023_s9, 1 }
   0xb   : > { %s2039_s14 = scalar_select %p29_p1, %s1935_s29, %s31_s12  }
   0xc   : > { %p40_p5 = por %p39_p2, %p38_p0  ;;  %p2041_p6 = por %p45_p4, %p44_p3 }
   0xd   : > { %3141 = sst [smem:[#allocation9_spill]] %s2039_s14  ;;  %p221_p8 = scmp.eq.s32.totalorder %s1480_s10, 1 }
   0xe   : > { %s3142_s15 = scalar_select %p2041_p6, 1, 0 }
   0xf   : > { %p1522_p10 = scmp.lt.s32.totalorder %s1939_s30, 2  ;;  %p2048_p11 = por %p215_p7, %p38_p0 }
  0x10   : > { %p2052_p12 = por %p221_p8, %p44_p3  ;;  %s262_s18 = sand.u32 1, %s1935_s29  }
  0x11   : > { %s3143_s16 = scalar_select %p2048_p11, 1, 0 }
  0x12   : > { %s3144_s17 = scalar_select %p2052_p12, 1, 0 }
  0x13   : > { %s1507_s19 = smul.u32 768, %s1939_s30  ;;  %p2063_p13 = pnand %p1522_p10, %p40_p5 }
  0x14   : > { %s1506_s20 = smul.u32 48, %s262_s18  ;;  %s263_s10 = scalar_lea.sflag [#allocation3], %s262_s18 }
  0x15   : > { %s2061_s23 = scalar_lea.hbm %s3128_s0, %s1507_s19  ;;  %p1849_p3 = pneg %p2063_p13 }
  0x16   : > { %s266_s25 = scalar_lea.vmem [#allocation2], %s1506_s20  ;;  %s1847_s12 = scalar_lea.hbm %s2061_s23, 768 }
  0x17   : > { %s274_s26 = sshll.u32 %s266_s25, 4  ;;  %p1848_p2 = scmp.ne.s32.totalorder %s2061_s23, %s1847_s12  ;;  %s275_s26 = int_to_ptr.vmem [resolvable:$true] %s274_s26 }
  0x18   : > { %s1852_s21 = scalar_lea.hbm %s3128_s0, 1536  ;;  %p1853_p5 = scmp.lt.s32.totalorder %s2061_s23, %s3128_s0 }
  0x19   : > { %p1850_p4 = pnand %p1849_p3, %p1848_p2  ;;  %p1854_p8 = scmp.lt.s32.totalorder %s1852_s21, %s1847_s12 }
  0x1b   : > { %p1851_p7 = pneg %p1850_p4  ;;  %p1855_p10 = por %p1854_p8, %p1853_p5 }
  0x1d   : > { %p1856_p9 = pnand %p1855_p10, %p1851_p7 }
  0x1f   : > { %1859 = shalt.err (!%p1856_p9)
}
  0x20   : > { %s1860_s20 = scalar_lea.vmem %s275_s26, 768  ;;  %s1941_s18 = smov [#allocation2]  }
  0x21   : > { %p1861_p0 = scmp.ne.s32.totalorder %s275_s26, %s1860_s20  ;;  %s1865_s25 = sshll.u32 %s1941_s18, 4  ;;  %s1866_s25 = int_to_ptr.vmem [resolvable:$false] %s1865_s25 }
  0x22   : > { %s1867_s29 = scalar_lea.vmem %s1866_s25, 1536  ;;  %p1868_p2 = scmp.lt.s32.totalorder %s275_s26, %s1866_s25 }
  0x23   : > { %p1863_p1 = pnand %p1861_p0, %p1849_p3  ;;  %p1869_p4 = scmp.lt.s32.totalorder %s1867_s29, %s1860_s20 }
  0x25   : > { %p1864_p12 = pneg %p1863_p1  ;;  %p1870_p11 = por %p1869_p4, %p1868_p2 }
  0x27   : > { %p1871_p6 = pnand %p1870_p11, %p1864_p12 }
  0x29   : > { %1874 = shalt.err (!%p1871_p6)
}
  0x2a   : > { %1517 = dma.hbm_to_vmem [thread:$0]  (!%p2063_p13), %s2061_s23, 768, %s275_s26, %s263_s10  }
  0x2b   : > { %p3146_p9 = scmp.lt.s32.totalorder %s1939_s30, 3  ;;  %p3147_p7 = scmp.ge.s32.totalorder %s1939_s30, 1 }
  0x2d   : > { %p280_p5 = pnand %p3147_p7, %p3146_p9 }
  0x2e   : > { %s2088_s14 = sand.u32 (!%p280_p5), 1, %s1931_s28   ;;  %p3148_p6 = scmp.ne.s32.totalorder (!%p280_p5), %s3142_s15, 0 }
  0x2f   : > { %283 = sbr.rel (%p280_p5) target bundleno = 1188 (0x4a4), region = 52  ;;  %s286_s12 = scalar_lea.sflag (!%p280_p5), [#allocation3], %s2088_s14 }
  0x30   : > { %s1508_s29 = smul.u32 (!%p280_p5), 48, %s2088_s14 }
  0x32   : > { %s289_s13 = scalar_lea.vmem (!%p280_p5), [#allocation2], %s1508_s29 }
  0x34   : > { %1918 = dma.done.wait (%p3148_p6), %s286_s12, 768  }
  0x35   : > { %1920 = vsyncadd (%p3148_p6), %s286_s12, 4294966528  ;;  %v2098_v0 = vld [vmem:[%s289_s13 + $0x8] sm:$0xff]  ;;  %v2100_v1 = vld [vmem:[%s289_s13 + $0x10] sm:$0xff]  ;;  %s1942_s23 = smov 88   ;;  %s1943_s24 = smov 86   ;;  %v1949_v11 = vmov 0   ;;  %v342_v14 = vlaneseq }
  0x36   : > { %v2102_v2 = vld [vmem:[%s289_s13] sm:$0xff]  ;;  %v1580_v3 = vpack.i.bf16 %v2100_v1, %v2098_v0  ;;  %v2108_v5 = vld [vmem:[%s289_s13 + $0x18] sm:$0xff]  ;;  %s1944_s15 = smov 87   ;;  %s1945_s26 = smov 106   ;;  %v2122_v9 = vld [vmem:[%s289_s13 + $0x28] sm:$0xff]  ;;  %576 = vmatprep.mubr.bf16.mxu0 %v1949_v11  ;;  %617 = vmatprep.mubr.bf16.mxu1 %v1949_v11  ;;  %vm525_vm3 = vcmask 1043456  }
  0x37   : > { %v1570_v4 = vpack.i.bf16 %v2098_v0, %v2102_v2  ;;  %v1575_v6 = vpack.i.bf16 %v2108_v5, %v2100_v1  ;;  %v1595_v7 = vpack.i.bf16 %v2108_v5, %v2102_v2  ;;  %s1946_s10 = smov 107   ;;  %v2120_v8 = vld [vmem:[%s289_s13 + $0x20] sm:$0xff]  ;;  %s1947_s19 = smov 126   ;;  %1655 = vset.pattern.permute.xlu1 %v1949_v11  ;;  %1846 = vset.pattern.permute.xlu0 %v1949_v11  ;;  %v2168_v15 = vand.u32 127, %v342_v14 }
  0x38   : > { %1581 = vrot.lane.b32.xlu1 %v1580_v3, %s1942_s23  ;;  %v1620_v10 = vpack.i.bf16 %v2122_v9, %v2120_v8  ;;  %s1948_s21 = smov 108   ;;  %s1950_s22 = smov 127   ;;  %v1650_v12 = vpack.i.bf16 %v2120_v8, %v2108_v5  ;;  %v515_v13 = vld [vmem:[%s3131_s3] sm:$0xff]  ;;  %vm521_vm9 = vcmask 588800  }
  0x39   : > { %1571 = vrot.lane.b32.xlu0 %v1570_v4, %s1943_s24  ;;  %vm477_vm0 = vcmp.lt.s32.totalorder %v2168_v15, 86  ;;  %vm458_vm1 = vcmp.lt.s32.totalorder %v2168_v15, 87  ;;  %vm439_vm2 = vcmp.lt.s32.totalorder %v2168_v15, 88  ;;  %vm401_vm4 = vcmp.lt.s32.totalorder %v2168_v15, 107  ;;  %s1955_s20 = smov 21   ;;  %p3149_p12 = scmp.ne.s32.totalorder %s3143_s16, 0 }
  0x3a   : > { %vm420_vm5 = vcmp.lt.s32.totalorder %v2168_v15, 106  ;;  %vm363_vm6 = vcmp.lt.s32.totalorder %v2168_v15, 126  ;;  %vm382_vm7 = vcmp.lt.s32.totalorder %v2168_v15, 108  ;;  %vm344_vm8 = vcmp.lt.s32.totalorder %v2168_v15, 127  ;;  %s1956_s25 = smov [#allocation5]  }
  0x3b   : > { %vm816_vm10 = vcmp.lt.s32.totalorder %v2168_v15, 109  ;;  %vm760_vm11 = vcmp.lt.s32.totalorder %v2168_v15, 19  ;;  %vm779_vm12 = vcmp.lt.s32.totalorder %v2168_v15, 1  ;;  %vm722_vm13 = vcmp.lt.s32.totalorder %v2168_v15, 21  ;;  %s1879_s12 = sshll.u32 %s1956_s25, 4  ;;  %s1880_s12 = int_to_ptr.vmem [resolvable:$false] %s1879_s12 }
  0x3c   : > { %1586 = vrot.lane.b32.xlu1 %v1580_v3, %s1944_s15  ;;  %vm741_vm14 = vcmp.lt.s32.totalorder %v2168_v15, 20  ;;  %s1881_s13 = scalar_lea.vmem %s1880_s12, 1536 }
  0x3d   : > { %1576 = vrot.lane.b32.xlu0 %v1575_v6, %s1943_s24 }
  0x40   : > { %1596 = vrot.lane.b32.xlu1 %v1595_v7, %s1944_s15 }
  0x41   : > { %1591 = vrot.lane.b32.xlu0 %v1595_v7, %s1942_s23 }
  0x44   : > { %1606 = vrot.lane.b32.xlu1 %v1580_v3, %s1945_s26 }
  0x45   : > { %1601 = vrot.lane.b32.xlu0 %v1580_v3, %s1946_s10 }
  0x48   : > { %1616 = vrot.lane.b32.xlu1 %v1595_v7, %s1945_s26 }
  0x49   : > { %1611 = vrot.lane.b32.xlu0 %v1595_v7, %s1946_s10 }
  0x4c   : > { %1626 = vrot.lane.b32.xlu1 %v1580_v3, %s1947_s19 }
  0x4d   : > { %1621 = vrot.lane.b32.xlu0 %v1620_v10, %s1943_s24  ;;  %s1951_s24 = smov 109  }
  0x50   : > { %1636 = vrot.lane.b32.xlu1 %v1595_v7, %s1947_s19 }
  0x51   : > { %1631 = vrot.lane.b32.xlu0 %v1580_v3, %s1948_s21 }
  0x54   : > { %435 = vrot.lane.b32.xlu1 %v2120_v8, %s1942_s23 }
  0x55   : > { %1641 = vrot.lane.b32.xlu0 %v1595_v7, %s1948_s21 }
  0x58   : > { %1646 = vrot.lane.b32.xlu1 %v1580_v3, %s1950_s22 }
  0x59   : > { %454 = vrot.lane.b32.xlu0 %v2120_v8, %s1944_s15 }
  0x5c   : > { %397 = vrot.lane.b32.xlu1 %v2120_v8, %s1946_s10 }
  0x5d   : > { %330 = vrot.lane.b32.xlu0 %v2102_v2, %s1950_s22 }
  0x60   : > { %359 = vrot.lane.b32.xlu1 %v2120_v8, %s1947_s19 }
  0x61   : > { %416 = vrot.lane.b32.xlu0 %v2120_v8, %s1945_s26 }
  0x64   : > { %437 = vrot.lane.b32.xlu1 %v2122_v9, %s1942_s23 }
  0x65   : > { %378 = vrot.lane.b32.xlu0 %v2120_v8, %s1948_s21 }
  0x68   : > { %1651 = vrot.lane.b32.xlu1 %v1650_v12, %s1950_s22 }
  0x69   : > { %456 = vrot.lane.b32.xlu0 %v2122_v9, %s1944_s15  ;;  %s1952_s15 = smov 1  }
  0x6c   : > { %418 = vrot.lane.b32.xlu1 %v2122_v9, %s1945_s26  ;;  %s1953_s26 = smov 20  }
  0x6d   : > { %399 = vrot.lane.b32.xlu0 %v2122_v9, %s1946_s10 }
  0x70   : > { %380 = vrot.lane.b32.xlu1 %v2122_v9, %s1948_s21 }
  0x71   : > { %361 = vrot.lane.b32.xlu0 %v2122_v9, %s1947_s19  ;;  %s1954_s19 = smov 19  }
  0x74   : > { %518 = vperm.xlu1 %1655, %v515_v13  }
  0x75   : > { %340 = vrot.lane.b32.xlu0 %v2122_v9, %s1950_s22 }
  0xaa   : > { %v2170_v16 = vpop.permute.xlu1 %1581 }
  0xab   : > { %v2172_v17 = vpop.permute.xlu0 %1571  ;;  %v1584_v21 = vunpack.i.h.bf16 %v2170_v16  ;;  %v1583_v24 = vunpack.i.l.bf16 %v2170_v16 }
  0xac   : > { %v1574_v18 = vunpack.i.h.bf16 %v2172_v17  ;;  %v1573_v19 = vunpack.i.l.bf16 %v2172_v17 }
  0xad   : > { %v443_v36 = vsel %vm439_vm2, %v1583_v24, %v1584_v21 }
  0xae   : > { %v482_v20 = vsel %vm477_vm0, %v1573_v19, %v1574_v18  ;;  %v2182_v22 = vpop.permute.xlu1 %1586 }
  0xaf   : > { %v1577_v23 = vpop.permute.xlu0 %1576  ;;  %v1589_v25 = vunpack.i.h.bf16 %v2182_v22  ;;  %v1588_v26 = vunpack.i.l.bf16 %v2182_v22  ;;  %v508_v28 = vpack.c.bf16 %v482_v20, %v482_v20 }
  0xb0   : > { %v1578_v27 = vunpack.i.l.bf16 %v1577_v23  ;;  %v1579_v48 = vunpack.i.h.bf16 %v1577_v23 }
  0xb1   : > { %v462_v30 = vsel %vm458_vm1, %v1588_v26, %v1589_v25  ;;  %v527_v37 = vsel %vm525_vm3, %v508_v28, 0 }
  0xb2   : > { %v481_v29 = vsel %vm477_vm0, %v1574_v18, %v1578_v27  ;;  %v2195_v31 = vpop.permute.xlu1 %1596  ;;  %v503_v38 = vpack.c.bf16 %v462_v30, %v443_v36  ;;  %v480_v58 = vsel %vm477_vm0, %v1578_v27, %v1579_v48 }
  0xb3   : > { %v2197_v32 = vpop.permute.xlu0 %1591  ;;  %v509_v33 = vpack.c.bf16 %v481_v29, %v481_v29  ;;  %v1598_v34 = vunpack.i.l.bf16 %v2195_v31  ;;  %v510_v63 = vpack.c.bf16 %v480_v58, %v480_v58  ;;  %v1599_v27 = vunpack.i.h.bf16 %v2195_v31 }
  0xb4   : > { %v1593_v35 = vunpack.i.l.bf16 %v2197_v32  ;;  %v1594_v28 = vunpack.i.h.bf16 %v2197_v32 }
  0xb5   : > { %1485 = vmatprep.subr.msk.bf16.mxu0 %vm525_vm3, %v509_v33  ;;  %v463_v40 = vsel %vm458_vm1, %v1598_v34, %v1588_v26  ;;  %v533_v20 = vsel %vm525_vm3, %v510_v63, 0 }
  0xb6   : > { %551 = vmatpush1.bf16.msra.mxu0 %v527_v37  ;;  %v444_v39 = vsel %vm439_vm2, %v1593_v35, %v1583_v24  ;;  %v2215_v41 = vpop.permute.xlu1 %1606 }
  0xb7   : > { %v2217_v42 = vpop.permute.xlu0 %1601  ;;  %552 = vmatprep.subr.bf16.mxu0 %v503_v38  ;;  %v502_v43 = vpack.c.bf16 %v463_v40, %v444_v39  ;;  %v1609_v44 = vunpack.i.h.bf16 %v2215_v41  ;;  %v1608_v45 = vunpack.i.l.bf16 %v2215_v41 }
  0xb8   : > { %v1604_v46 = vunpack.i.h.bf16 %v2217_v42  ;;  %v1603_v47 = vunpack.i.l.bf16 %v2217_v42 }
  0xb9   : > { %v424_v50 = vsel %vm420_vm5, %v1608_v45, %v1609_v44 }
  0xba   : > { %553 = vmatpush1.bf16.msra.mxu0 %v502_v43  ;;  %v405_v49 = vsel %vm401_vm4, %v1603_v47, %v1604_v46  ;;  %v2233_v51 = vpop.permute.xlu1 %1616 }
  0xbb   : > { %v2235_v52 = vpop.permute.xlu0 %1611  ;;  %v497_v53 = vpack.c.bf16 %v424_v50, %v405_v49  ;;  %v1618_v54 = vunpack.i.l.bf16 %v2233_v51 }
  0xbc   : > { %v1613_v55 = vunpack.i.l.bf16 %v2235_v52 }
  0xbd   : > { %554 = vmatprep.subr.bf16.mxu0 %v497_v53  ;;  %v425_v57 = vsel %vm420_vm5, %v1618_v54, %v1608_v45 }
  0xbe   : > { %v406_v56 = vsel %vm401_vm4, %v1613_v55, %v1603_v47  ;;  %v2249_v59 = vpop.permute.xlu1 %1626  ;;  %v442_v47 = vsel %vm439_vm2, %v1584_v21, %v1594_v28  ;;  %v1619_v21 = vunpack.i.h.bf16 %v2233_v51 }
  0xbf   : > { %v1622_v60 = vpop.permute.xlu0 %1621  ;;  %v496_v61 = vpack.c.bf16 %v425_v57, %v406_v56  ;;  %v1629_v3 = vunpack.i.h.bf16 %v2249_v59  ;;  %v1628_v4 = vunpack.i.l.bf16 %v2249_v59 }
  0xc0   : > { %v1623_v62 = vunpack.i.l.bf16 %v1622_v60  ;;  %v1624_v39 = vunpack.i.h.bf16 %v1622_v60 }
  0xc1   : > { %555 = vmatpush1.bf16.msra.mxu0 %v496_v61  ;;  %v367_v24 = vsel %vm363_vm6, %v1628_v4, %v1629_v3 }
  0xc2   : > { %v479_v6 = vsel %vm477_vm0, %v1579_v48, %v1623_v62  ;;  %v2255_v7 = vpop.permute.xlu1 %1636  ;;  %v461_v48 = vsel %vm458_vm1, %v1589_v25, %v1599_v27  ;;  %v1614_v25 = vunpack.i.h.bf16 %v2235_v52  ;;  %v483_v58 = vsel %vm477_vm0, %v1624_v39, %v1573_v19 }
  0xc3   : > { %v2257_v10 = vpop.permute.xlu0 %1631  ;;  %v511_v12 = vpack.c.bf16 %v479_v6, %v479_v6  ;;  %v1638_v23 = vunpack.i.l.bf16 %v2255_v7  ;;  %v504_v57 = vpack.c.bf16 %v461_v48, %v442_v47  ;;  %v513_v17 = vpack.c.bf16 %v483_v58, %v483_v58 }
  0xc4   : > { %v1634_v13 = vunpack.i.h.bf16 %v2257_v10  ;;  %v1633_v18 = vunpack.i.l.bf16 %v2257_v10 }
  0xc5   : > { %1487 = vmatprep.subr.msk.bf16.mxu1 %vm525_vm3, %v511_v12  ;;  %v368_v37 = vsel %vm363_vm6, %v1638_v23, %v1628_v4  ;;  %v478_v4 = vsel %vm477_vm0, %v1623_v62, %v1624_v39  ;;  %v404_v62 = vsel %vm401_vm4, %v1604_v46, %v1614_v25 }
  0xc6   : > { %592 = vmatpush1.bf16.msra.mxu1 %v533_v20  ;;  %v386_v26 = vsel %vm382_vm7, %v1633_v18, %v1634_v13  ;;  %v2276_v29 = vpop.permute.xlu1 %435 }
  0xc7   : > { %v2278_v30 = vpop.permute.xlu0 %1641  ;;  %v491_v33 = vpack.c.bf16 %v386_v26, %v367_v24  ;;  %v441_v49 = vsel %vm439_vm2, %v1594_v28, %v2276_v29  ;;  %v1639_v28 = vunpack.i.h.bf16 %v2255_v7 }
  0xc8   : > { %v1643_v36 = vunpack.i.l.bf16 %v2278_v30  ;;  %v1644_v19 = vunpack.i.h.bf16 %v2278_v30 }
  0xc9   : > { %556 = vmatprep.subr.bf16.mxu0 %v491_v33  ;;  %v366_v47 = vsel %vm363_vm6, %v1629_v3, %v1639_v28 }
  0xca   : > { %v387_v38 = vsel %vm382_vm7, %v1643_v36, %v1633_v18  ;;  %v2290_v40 = vpop.permute.xlu1 %1646  ;;  %v512_v18 = vpack.c.bf16 %v478_v4, %v478_v4 }
  0xcb   : > { %v455_v43 = vpop.permute.xlu0 %454  ;;  %v490_v45 = vpack.c.bf16 %v387_v38, %v368_v37  ;;  %v1649_v50 = vunpack.i.h.bf16 %v2290_v40  ;;  %v1648_v53 = vunpack.i.l.bf16 %v2290_v40 }
  0xcc   : > { %v460_v56 = vsel %vm458_vm1, %v1599_v27, %v455_v43  ;;  %v539_v42 = vsel %vm525_vm3, %v512_v18, 0 }
  0xcd   : > { %v505_v16 = vpack.c.bf16 %v460_v56, %v441_v49  ;;  %557 = vmatpush1.bf16.msra.mxu0 %v490_v45  ;;  %v348_v22 = vsel %vm344_vm8, %v1648_v53, %v1649_v50 }
  0xce   : > { %v398_v60 = vpop.permute.xlu1 %397  ;;  %v485_v63 = vpack.c.bf16 %v348_v22, %v2098_v0  ;;  %v2330_v0 = vld [vmem:[%s3130_s2] sm:$0xf] }
  0xcf   : > { %v2317_v61 = vpop.permute.xlu0 %330  ;;  %593 = vmatprep.subr.bf16.mxu1 %v505_v16  ;;  %v403_v26 = vsel %vm401_vm4, %v1614_v25, %v398_v60 }
  0xd0   : > { %v349_v6 = vsel %vm344_vm8, %v2317_v61, %v1648_v53  ;;  %594 = vmatpush1.bf16.msra.mxu1 %v504_v57  ;;  %558 = vmatprep.subr.bf16.mxu0 %v485_v63 }
  0xd1   : > { %v484_v12 = vpack.c.bf16 %v349_v6, %v2102_v2  ;;  %v423_v2 = vsel %vm420_vm5, %v1609_v44, %v1619_v21  ;;  %v385_v44 = vsel %vm382_vm7, %v1634_v13, %v1644_v19 }
  0xd2   : > { %v360_v20 = vpop.permute.xlu1 %359  ;;  %v498_v41 = vpack.c.bf16 %v423_v2, %v404_v62  ;;  %v492_v48 = vpack.c.bf16 %v385_v44, %v366_v47 }
  0xd3   : > { %v417_v24 = vpop.permute.xlu0 %416  ;;  %559 = vmatpush1.bf16.msra.mxu0 %v484_v12  ;;  %v365_v38 = vsel %vm363_vm6, %v1639_v28, %v360_v20  ;;  %v675_v12 = vshrl.u32 %v342_v14, 7 }
  0xd4   : > { %v422_v27 = vsel %vm420_vm5, %v1619_v21, %v417_v24  ;;  %1489 = vmatprep.subr.msk.bf16.mxu0 %vm525_vm3, %v513_v17 }
  0xd5   : > { %v499_v33 = vpack.c.bf16 %v422_v27, %v403_v26  ;;  %v676_v17 = vsub.s32 0, %v675_v12 }
  0xd6   : > { %1486 = vmatmul.mubr.msk.bf16.vlgmr.msra.gmra.mxu0 %vm521_vm9, %v2330_v0  ;;  %v438_v46 = vpop.permute.xlu1 %437 }
  0xd7   : > { %v379_v37 = vpop.permute.xlu0 %378  ;;  %595 = vmatprep.subr.bf16.mxu1 %v499_v33  ;;  %633 = vmatpush1.bf16.msra.mxu0 %v539_v42  ;;  %v440_v10 = vsel %vm439_vm2, %v2276_v29, %v438_v46  ;;  %v445_v13 = vsel %vm439_vm2, %v438_v46, %v1593_v35  ;;  %v688_v46 = vsub.s32 3, %v675_v12 }
  0xd8   : > { %v384_v39 = vsel %vm382_vm7, %v1644_v19, %v379_v37  ;;  %596 = vmatpush1.bf16.msra.mxu1 %v498_v41  ;;  %658 = vmatprep.mubr.bf16.mxu0 %v1949_v11  ;;  %v680_v19 = vsub.s32 1, %v675_v12  ;;  %v684_v41 = vsub.s32 2, %v675_v12 }
  0xd9   : > { %v493_v45 = vpack.c.bf16 %v384_v39, %v365_v38 }
  0xda   : > { %v1652_v49 = vpop.permute.xlu1 %1651 }
  0xdb   : > { %v457_v53 = vpop.permute.xlu0 %456  ;;  %597 = vmatprep.subr.bf16.mxu1 %v493_v45  ;;  %v1654_v56 = vunpack.i.h.bf16 %v1652_v49  ;;  %v1653_v16 = vunpack.i.l.bf16 %v1652_v49 }
  0xdc   : > { %v459_v59 = vsel %vm458_vm1, %v455_v43, %v457_v53  ;;  %v464_v3 = vsel %vm458_vm1, %v457_v53, %v1598_v34  ;;  %598 = vmatpush1.bf16.msra.mxu1 %v492_v48 }
  0xdd   : > { %v506_v29 = vpack.c.bf16 %v459_v59, %v440_v10  ;;  %v507_v21 = vpack.c.bf16 %v464_v3, %v445_v13  ;;  %v346_v32 = vsel %vm344_vm8, %v1653_v16, %v1654_v56  ;;  %v347_v35 = vsel %vm344_vm8, %v1649_v50, %v1653_v16 }
  0xde   : > { %v419_v57 = vpop.permute.xlu1 %418  ;;  %v487_v43 = vpack.c.bf16 %v346_v32, %v2108_v5  ;;  %v486_v31 = vpack.c.bf16 %v347_v35, %v2100_v1 }
  0xdf   : > { %v400_v22 = vpop.permute.xlu0 %399  ;;  %634 = vmatprep.subr.bf16.mxu0 %v507_v21  ;;  %v421_v34 = vsel %vm420_vm5, %v417_v24, %v419_v57  ;;  %v426_v25 = vsel %vm420_vm5, %v419_v57, %v1618_v54  ;;  %v692_v57 = vsub.s32 4, %v675_v12 }
  0xe0   : > { %v402_v40 = vsel %vm401_vm4, %v398_v60, %v400_v22  ;;  %v407_v50 = vsel %vm401_vm4, %v400_v22, %v1613_v55  ;;  %635 = vmatpush1.bf16.msra.mxu0 %v506_v29  ;;  %599 = vmatprep.subr.bf16.mxu1 %v487_v43 }
  0xe1   : > { %v500_v5 = vpack.c.bf16 %v421_v34, %v402_v40  ;;  %v501_v58 = vpack.c.bf16 %v426_v25, %v407_v50  ;;  %600 = vmatpush1.bf16.msra.mxu1 %v486_v31  ;;  %v696_v31 = vsub.s32 5, %v675_v12 }
  0xe2   : > { %v381_v1 = vpop.permute.xlu1 %380 }
  0xe3   : > { %v362_v63 = vpop.permute.xlu0 %361  ;;  %636 = vmatprep.subr.bf16.mxu0 %v501_v58  ;;  %v383_v51 = vsel %vm382_vm7, %v379_v37, %v381_v1  ;;  %v388_v54 = vsel %vm382_vm7, %v381_v1, %v1643_v36 }
  0xe4   : > { %v364_v52 = vsel %vm363_vm6, %v360_v20, %v362_v63  ;;  %v369_v55 = vsel %vm363_vm6, %v362_v63, %v1638_v23  ;;  %637 = vmatpush1.bf16.msra.mxu0 %v500_v5  ;;  %1488 = vmatmul.mubr.msk.bf16.vlgmr.msra.gmra.mxu1 %vm521_vm9, %v2330_v0 }
  0xe5   : > { %v494_v60 = vpack.c.bf16 %v383_v51, %v364_v52  ;;  %v495_v4 = vpack.c.bf16 %v388_v54, %v369_v55  ;;  %949 = vmatprep.mubr.bf16.mxu1 %v1949_v11  ;;  %v890_v51 = vld [vmem:[%s3133_s5] sm:$0xff] }
  0xe7   : > { %v341_v30 = vpop.permute.xlu0 %340  ;;  %638 = vmatprep.subr.bf16.mxu0 %v495_v4 }
  0xe8   : > { %v345_v36 = vsel %vm344_vm8, %v1654_v56, %v341_v30  ;;  %v350_v7 = vsel %vm344_vm8, %v341_v30, %v2317_v61  ;;  %639 = vmatpush1.bf16.msra.mxu0 %v494_v60  ;;  %v323_v61 = vld [vmem:[%s3129_s1] sm:$0x3f] }
  0xe9   : > { %v488_v23 = vpack.c.bf16 %v345_v36, %v2120_v8  ;;  %v489_v6 = vpack.c.bf16 %v350_v7, %v2122_v9  ;;  %v2424_v24 = vrot.slane %v323_v61, %v676_v17  ;;  %v2426_v26 = vrot.slane %v323_v61, %v680_v19 }
  0xea   : > { %v2437_v38 = vrot.slane %v323_v61, %v684_v41  ;;  %v2439_v48 = vrot.slane %v323_v61, %v688_v46  ;;  %v2462_v25 = vrot.slane %v323_v61, %v692_v57  ;;  %v2464_v50 = vrot.slane %v323_v61, %v696_v31 }
  0xeb   : > { %640 = vmatprep.subr.bf16.mxu0 %v489_v6 }
  0xec   : > { %641 = vmatpush1.bf16.msra.mxu0 %v488_v23 }
  0xef   : > { %1490 = vmatmul.mubr.msk.bf16.vlgmr.msra.gmra.mxu0 %vm521_vm9, %v2330_v0  ;;  %v519_v18 = vpop.permute.xlu1 %518 }
  0xf0   : > { %990 = vmatprep.mubr.bf16.mxu0 %v1949_v11 }
 0x196   : > { %v578_v20 = vpop.f32.mrf.mxu0 }
 0x197   : > { %v579_v8 = vadd.f32 %v578_v20, %v519_v18 }
 0x198   : > { %v580_v9 = vpop.f32.mrf.mxu0 }
 0x199   : > { %v667_v62 = vmax.f32 %v579_v8, 0.0  ;;  %v581_v2 = vadd.f32 %v580_v9, %v519_v18 }
 0x19a   : > { %v582_v0 = vpop.f32.mrf.mxu0 }
 0x19b   : > { %v668_v27 = vmax.f32 %v581_v2, 0.0  ;;  %v2429_v14 = vmul.f32 %v2424_v24, %v667_v62 }
 0x19c   : > { %v583_v28 = vpop.f32.mrf.mxu0 }
 0x19d   : > { %v2432_v33 = vmul.f32 %v2426_v26, %v668_v27 }
 0x19f   : > { %v1656_v42 = vpack.i.bf16 %v2432_v33, %v2429_v14 }
 0x1a1   : > { %1657 = vrot.lane.b32.xlu0 %v1656_v42, %s1946_s10 }
 0x1a4   : > { %v619_v37 = vpop.f32.mrf.mxu1 }
 0x1a5   : > { %v620_v44 = vadd.f32 %v619_v37, %v519_v18 }
 0x1a6   : > { %v621_v39 = vpop.f32.mrf.mxu1 }
 0x1a7   : > { %v669_v45 = vmax.f32 %v620_v44, 0.0  ;;  %v622_v47 = vadd.f32 %v621_v39, %v519_v18 }
 0x1a8   : > { %v623_v10 = vpop.f32.mrf.mxu1 }
 0x1a9   : > { %v2442_v13 = vmul.f32 %v2437_v38, %v669_v45  ;;  %v670_v49 = vmax.f32 %v622_v47, 0.0 }
 0x1aa   : > { %v624_v53 = vpop.f32.mrf.mxu1 }
 0x1ab   : > { %v2445_v56 = vmul.f32 %v2439_v48, %v670_v49  ;;  %v1666_v16 = vpack.i.bf16 %v2442_v13, %v2432_v33 }
 0x1ad   : > { %1667 = vrot.lane.b32.xlu0 %v1666_v16, %s1951_s24  ;;  %v1661_v59 = vpack.i.bf16 %v2445_v56, %v2442_v13  ;;  %v1676_v29 = vpack.i.bf16 %v2445_v56, %v2429_v14 }
 0x1af   : > { %v660_v3 = vpop.f32.mrf.mxu0  ;;  %1662 = vrot.lane.b32.xlu1 %v1661_v59, %s1946_s10 }
 0x1b0   : > { %v661_v22 = vadd.f32 %v660_v3, %v519_v18 }
 0x1b1   : > { %v662_v21 = vpop.f32.mrf.mxu0  ;;  %1677 = vrot.lane.b32.xlu0 %v1676_v29, %s1951_s24 }
 0x1b2   : > { %v663_v43 = vadd.f32 %v662_v21, %v519_v18  ;;  %v671_v34 = vmax.f32 %v661_v22, 0.0 }
 0x1b3   : > { %v664_v32 = vpop.f32.mrf.mxu0  ;;  %1672 = vrot.lane.b32.xlu1 %v1666_v16, %s1948_s21 }
 0x1b4   : > { %v672_v40 = vmax.f32 %v663_v43, 0.0  ;;  %v2470_v5 = vmul.f32 %v2462_v25, %v671_v34 }
 0x1b5   : > { %v665_v35 = vpop.f32.mrf.mxu0  ;;  %1687 = vrot.lane.b32.xlu0 %v1666_v16, %s1950_s22 }
 0x1b6   : > { %v2473_v58 = vmul.f32 %v2464_v50, %v672_v40 }
 0x1b7   : > { %1682 = vrot.lane.b32.xlu1 %v1676_v29, %s1948_s21 }
 0x1b8   : > { %v1716_v1 = vpack.i.bf16 %v2473_v58, %v2470_v5  ;;  %v1726_v63 = vpack.i.bf16 %v2442_v13, %v2473_v58 }
 0x1b9   : > { %1702 = vrot.lane.b32.xlu0 %v1656_v42, %s1952_s15 }
 0x1bb   : > { %1692 = vrot.lane.b32.xlu1 %v1676_v29, %s1950_s22 }
 0x1bd   : > { %1712 = vrot.lane.b32.xlu0 %v1656_v42, %s1953_s26 }
 0x1bf   : > { %1697 = vrot.lane.b32.xlu1 %v1656_v42, %s1954_s19 }
 0x1c1   : > { %754 = vrot.lane.b32.xlu0 %v2445_v56, %s1954_s19 }
 0x1c3   : > { %1707 = vrot.lane.b32.xlu1 %v1656_v42, %s1955_s20 }
 0x1c5   : > { %831 = vrot.lane.b32.xlu0 %v2470_v5, %s1948_s21 }
 0x1c7   : > { %773 = vrot.lane.b32.xlu1 %v2445_v56, %s1952_s15 }
 0x1c9   : > { %1717 = vrot.lane.b32.xlu0 %v1716_v1, %s1946_s10 }
 0x1cb   : > { %812 = vrot.lane.b32.xlu1 %v2470_v5, %s1951_s24 }
 0x1cd   : > { %1727 = vrot.lane.b32.xlu0 %v1726_v63, %s1952_s15 }
 0x1cf   : > { %794 = vrot.lane.b32.xlu1 %v2470_v5, %s1950_s22 }
 0x1d1   : > { %739 = vrot.lane.b32.xlu0 %v2473_v58, %s1953_s26 }
 0x1d3   : > { %1722 = vrot.lane.b32.xlu1 %v1726_v63, %s1954_s19 }
 0x1d5   : > { %1732 = vrot.lane.b32.xlu0 %v1661_v59, %s1955_s20 }
 0x1d7   : > { %720 = vrot.lane.b32.xlu1 %v2473_v58, %s1955_s20 }
 0x1d9   : > { %814 = vrot.lane.b32.xlu0 %v2473_v58, %s1951_s24 }
 0x1db   : > { %833 = vrot.lane.b32.xlu1 %v2473_v58, %s1948_s21 }
 0x1dd   : > { %796 = vrot.lane.b32.xlu0 %v2473_v58, %s1950_s22 }
 0x1df   : > { %1737 = vrot.lane.b32.xlu1 %v1661_v59, %s1953_s26 }
 0x1e1   : > { %775 = vrot.lane.b32.xlu0 %v2470_v5, %s1952_s15 }
 0x1e3   : > { %756 = vrot.lane.b32.xlu1 %v2470_v5, %s1954_s19 }
 0x1e5   : > { %737 = vrot.lane.b32.xlu0 %v2470_v5, %s1953_s26 }
 0x1e7   : > { %718 = vrot.lane.b32.xlu1 %v2470_v5, %s1955_s20 }
 0x1eb   : > { %893 = vperm.xlu1 %1655, %v890_v51  }
 0x213   : > { %v2514_v54 = vpop.permute.xlu0 %1657 }
 0x214   : > { %v1660_v52 = vunpack.i.h.bf16 %v2514_v54  ;;  %v1659_v55 = vunpack.i.l.bf16 %v2514_v54 }
 0x216   : > { %v857_v4 = vsel %vm401_vm4, %v1659_v55, %v1660_v52 }
 0x217   : > { %v883_v12 = vpack.c.bf16 %v857_v4, %v857_v4 }
 0x219   : > { %v900_v9 = vsel %vm525_vm3, %v883_v12, 0 }
 0x21f   : > { %v2518_v60 = vpop.permute.xlu0 %1667 }
 0x220   : > { %v1670_v7 = vunpack.i.h.bf16 %v2518_v60  ;;  %v1669_v23 = vunpack.i.l.bf16 %v2518_v60 }
 0x221   : > { %v2524_v30 = vpop.permute.xlu1 %1662 }
 0x222   : > { %v1664_v36 = vunpack.i.l.bf16 %v2524_v30  ;;  %v820_v62 = vsel %vm816_vm10, %v1669_v23, %v1670_v7  ;;  %v1665_v1 = vunpack.i.h.bf16 %v2524_v30 }
 0x223   : > { %v2529_v6 = vpop.permute.xlu0 %1677 }
 0x224   : > { %v856_v17 = vsel %vm401_vm4, %v1660_v52, %v1664_v36  ;;  %v1679_v2 = vunpack.i.l.bf16 %v2529_v6  ;;  %v855_v52 = vsel %vm401_vm4, %v1664_v36, %v1665_v1 }
 0x225   : > { %v884_v18 = vpack.c.bf16 %v856_v17, %v856_v17  ;;  %v1673_v61 = vpop.permute.xlu1 %1672 }
 0x226   : > { %v1675_v19 = vunpack.i.h.bf16 %v1673_v61  ;;  %v1674_v20 = vunpack.i.l.bf16 %v1673_v61  ;;  %v821_v39 = vsel %vm816_vm10, %v1679_v2, %v1669_v23  ;;  %v1680_v23 = vunpack.i.h.bf16 %v2529_v6 }
 0x227   : > { %v2534_v8 = vpop.permute.xlu0 %1687  ;;  %1491 = vmatprep.subr.msk.bf16.mxu1 %vm525_vm3, %v884_v18  ;;  %v885_v61 = vpack.c.bf16 %v855_v52, %v855_v52 }
 0x228   : > { %v1690_v0 = vunpack.i.h.bf16 %v2534_v8  ;;  %v1689_v27 = vunpack.i.l.bf16 %v2534_v8  ;;  %924 = vmatpush1.bf16.msra.mxu1 %v900_v9  ;;  %v838_v28 = vsel %vm382_vm7, %v1674_v20, %v1675_v19 }
 0x229   : > { %v2547_v42 = vpop.permute.xlu1 %1682  ;;  %v878_v41 = vpack.c.bf16 %v838_v28, %v820_v62 }
 0x22a   : > { %v1684_v46 = vunpack.i.l.bf16 %v2547_v42  ;;  %v801_v44 = vsel %vm344_vm8, %v1689_v27, %v1690_v0  ;;  %v1685_v17 = vunpack.i.h.bf16 %v2547_v42 }
 0x22b   : > { %v2550_v37 = vpop.permute.xlu0 %1702  ;;  %925 = vmatprep.subr.bf16.mxu1 %v878_v41  ;;  %v872_v53 = vpack.c.bf16 %v801_v44, %v2432_v33 }
 0x22c   : > { %v839_v45 = vsel %vm382_vm7, %v1684_v46, %v1674_v20  ;;  %v1705_v59 = vunpack.i.h.bf16 %v2550_v37  ;;  %v1704_v3 = vunpack.i.l.bf16 %v2550_v37  ;;  %v837_v28 = vsel %vm382_vm7, %v1675_v19, %v1685_v17 }
 0x22d   : > { %v877_v47 = vpack.c.bf16 %v839_v45, %v821_v39  ;;  %v2564_v10 = vpop.permute.xlu1 %1692  ;;  %v906_v39 = vsel %vm525_vm3, %v885_v61, 0 }
 0x22e   : > { %v1694_v49 = vunpack.i.l.bf16 %v2564_v10  ;;  %v784_v31 = vsel %vm779_vm12, %v1704_v3, %v1705_v59  ;;  %v1695_v36 = vunpack.i.h.bf16 %v2564_v10 }
 0x22f   : > { %v2568_v16 = vpop.permute.xlu0 %1712  ;;  %926 = vmatpush1.bf16.msra.mxu1 %v877_v47  ;;  %v819_v47 = vsel %vm816_vm10, %v1670_v7, %v1680_v23 }
 0x230   : > { %v802_v29 = vsel %vm344_vm8, %v1694_v49, %v1689_v27  ;;  %927 = vmatprep.subr.bf16.mxu1 %v872_v53  ;;  %v800_v60 = vsel %vm344_vm8, %v1690_v0, %v1695_v36 }
 0x231   : > { %v871_v21 = vpack.c.bf16 %v802_v29, %v2429_v14  ;;  %v2577_v32 = vpop.permute.xlu1 %1697  ;;  %v873_v0 = vpack.c.bf16 %v800_v60, %v2442_v13 }
 0x232   : > { %v1700_v35 = vunpack.i.h.bf16 %v2577_v32  ;;  %v1699_v57 = vunpack.i.l.bf16 %v2577_v32  ;;  %v1715_v32 = vunpack.i.h.bf16 %v2568_v16 }
 0x233   : > { %v2583_v22 = vpop.permute.xlu0 %754  ;;  %928 = vmatpush1.bf16.msra.mxu1 %v871_v21  ;;  %v879_v21 = vpack.c.bf16 %v837_v28, %v819_v47 }
 0x234   : > { %v765_v43 = vsel %vm760_vm11, %v1699_v57, %v1700_v35 }
 0x235   : > { %v2593_v34 = vpop.permute.xlu1 %1707  ;;  %v866_v40 = vpack.c.bf16 %v784_v31, %v765_v43  ;;  %v1714_v43 = vunpack.i.l.bf16 %v2568_v16 }
 0x236   : > { %v1710_v53 = vunpack.i.h.bf16 %v2593_v34  ;;  %v1709_v19 = vunpack.i.l.bf16 %v2593_v34 }
 0x237   : > { %v2596_v63 = vpop.permute.xlu0 %831  ;;  %929 = vmatprep.subr.bf16.mxu1 %v866_v40 }
 0x238   : > { %v836_v27 = vsel %vm382_vm7, %v1685_v17, %v2596_v63  ;;  %v727_v8 = vsel %vm722_vm13, %v1709_v19, %v1710_v53 }
 0x239   : > { %v2598_v51 = vpop.permute.xlu1 %773 }
 0x23b   : > { %v1718_v4 = vpop.permute.xlu0 %1717 }
 0x23c   : > { %v1719_v12 = vunpack.i.l.bf16 %v1718_v4  ;;  %v1720_v52 = vunpack.i.h.bf16 %v1718_v4 }
 0x23d   : > { %v2604_v18 = vpop.permute.xlu1 %812 }
 0x23e   : > { %v854_v30 = vsel %vm401_vm4, %v1665_v1, %v1719_v12  ;;  %v818_v20 = vsel %vm816_vm10, %v1680_v23, %v2604_v18 }
 0x23f   : > { %v886_v9 = vpack.c.bf16 %v854_v30, %v854_v30  ;;  %v2611_v62 = vpop.permute.xlu0 %1727  ;;  %v880_v41 = vpack.c.bf16 %v836_v27, %v818_v20  ;;  %v746_v20 = vsel %vm741_vm14, %v1714_v43, %v1715_v32 }
 0x240   : > { %v1729_v31 = vunpack.i.l.bf16 %v2611_v62  ;;  %v1730_v7 = vunpack.i.h.bf16 %v2611_v62 }
 0x241   : > { %v2619_v44 = vpop.permute.xlu1 %794  ;;  %1493 = vmatprep.subr.msk.bf16.mxu0 %vm525_vm3, %v886_v9 }
 0x242   : > { %v799_v45 = vsel %vm344_vm8, %v1695_v36, %v2619_v44  ;;  %965 = vmatpush1.bf16.msra.mxu0 %v906_v39  ;;  %v785_v4 = vsel %vm779_vm12, %v1729_v31, %v1704_v3  ;;  %v782_v28 = vsel %vm779_vm12, %v1730_v7, %v2598_v51  ;;  %v860_v39 = vpack.c.bf16 %v746_v20, %v727_v8 }
 0x243   : > { %v2632_v29 = vpop.permute.xlu0 %739  ;;  %966 = vmatprep.subr.bf16.mxu0 %v880_v41  ;;  %v874_v40 = vpack.c.bf16 %v799_v45, %v2445_v56  ;;  %v858_v45 = vsel %vm401_vm4, %v1720_v52, %v1659_v55  ;;  %v783_v47 = vsel %vm779_vm12, %v1705_v59, %v1730_v7 }
 0x245   : > { %v2645_v1 = vpop.permute.xlu1 %1722 }
 0x246   : > { %v1725_v23 = vunpack.i.h.bf16 %v2645_v1  ;;  %v1724_v17 = vunpack.i.l.bf16 %v2645_v1  ;;  %967 = vmatpush1.bf16.msra.mxu0 %v879_v21 }
 0x247   : > { %v2649_v61 = vpop.permute.xlu0 %1732  ;;  %968 = vmatprep.subr.bf16.mxu0 %v874_v40 }
 0x248   : > { %v766_v30 = vsel %vm760_vm11, %v1724_v17, %v1699_v57  ;;  %v764_v9 = vsel %vm760_vm11, %v1700_v35, %v1725_v23  ;;  %v763_v3 = vsel %vm760_vm11, %v1725_v23, %v2583_v22  ;;  %v853_v35 = vsel %vm401_vm4, %v1719_v12, %v1720_v52 }
 0x249   : > { %v865_v36 = vpack.c.bf16 %v785_v4, %v766_v30  ;;  %v2672_v27 = vpop.permute.xlu1 %720  ;;  %v868_v41 = vpack.c.bf16 %v782_v28, %v763_v3  ;;  %v867_v60 = vpack.c.bf16 %v783_v47, %v764_v9  ;;  %v887_v54 = vpack.c.bf16 %v853_v35, %v853_v35 }
 0x24a   : > { %v728_v57 = vsel %vm722_vm13, %v2672_v27, %v1709_v19  ;;  %969 = vmatpush1.bf16.msra.mxu0 %v873_v0  ;;  %v747_v19 = vsel %vm741_vm14, %v2632_v29, %v1714_v43  ;;  %v888_v23 = vpack.c.bf16 %v858_v45, %v858_v45  ;;  %v1734_v55 = vunpack.i.l.bf16 %v2649_v61  ;;  %v889_v43 = vld [vmem:[%s3132_s4] sm:$0xf] }
 0x24b   : > { %v815_v21 = vpop.permute.xlu0 %814  ;;  %930 = vmatpush1.bf16.msra.mxu1 %v865_v36  ;;  %970 = vmatprep.subr.bf16.mxu0 %v868_v41  ;;  %v859_v12 = vpack.c.bf16 %v747_v19, %v728_v57  ;;  %v1735_v7 = vunpack.i.h.bf16 %v2649_v61  ;;  %v912_v42 = vsel %vm525_vm3, %v887_v54, 0 }
 0x24c   : > { %931 = vmatprep.subr.bf16.mxu1 %v860_v39  ;;  %v822_v52 = vsel %vm816_vm10, %v815_v21, %v1679_v2  ;;  %v726_v6 = vsel %vm722_vm13, %v1710_v53, %v1734_v55 }
 0x24d   : > { %v834_v40 = vpop.permute.xlu1 %833  ;;  %v725_v10 = vsel %vm722_vm13, %v1734_v55, %v1735_v7 }
 0x24e   : > { %971 = vmatpush1.bf16.msra.mxu0 %v867_v60  ;;  %v840_v37 = vsel %vm382_vm7, %v834_v40, %v1684_v46  ;;  %v835_v46 = vsel %vm382_vm7, %v2596_v63, %v834_v40  ;;  %v817_v63 = vsel %vm816_vm10, %v2604_v18, %v815_v21 }
 0x24f   : > { %v797_v59 = vpop.permute.xlu0 %796  ;;  %932 = vmatpush1.bf16.msra.mxu1 %v859_v12  ;;  %v882_v0 = vpack.c.bf16 %v840_v37, %v822_v52  ;;  %v881_v53 = vpack.c.bf16 %v835_v46, %v817_v63 }
 0x250   : > { %1495 = vmatprep.subr.msk.bf16.mxu1 %vm525_vm3, %v888_v23  ;;  %v803_v2 = vsel %vm344_vm8, %v797_v59, %v1694_v49  ;;  %v798_v18 = vsel %vm344_vm8, %v2619_v44, %v797_v59 }
 0x251   : > { %v1738_v8 = vpop.permute.xlu1 %1737  ;;  %v876_v16 = vpack.c.bf16 %v803_v2, %v2473_v58  ;;  %v875_v3 = vpack.c.bf16 %v798_v18, %v2470_v5 }
 0x252   : > { %v1740_v4 = vunpack.i.h.bf16 %v1738_v8  ;;  %v1739_v30 = vunpack.i.l.bf16 %v1738_v8  ;;  %1492 = vmatmul.mubr.msk.bf16.vlgmr.msra.gmra.mxu1 %vm521_vm9, %v889_v43 }
 0x253   : > { %1006 = vmatpush1.bf16.msra.mxu1 %v912_v42  ;;  %1031 = vmatprep.mubr.bf16.mxu1 %v1949_v11  ;;  %v776_v61 = vpop.permute.xlu0 %775 }
 0x254   : > { %v745_v34 = vsel %vm741_vm14, %v1715_v32, %v1739_v30  ;;  %1007 = vmatprep.subr.bf16.mxu1 %v882_v0  ;;  %v744_v49 = vsel %vm741_vm14, %v1739_v30, %v1740_v4  ;;  %v780_v28 = vsel %vm779_vm12, %v776_v61, %v1729_v31  ;;  %v781_v62 = vsel %vm779_vm12, %v2598_v51, %v776_v61 }
 0x255   : > { %v861_v20 = vpack.c.bf16 %v745_v34, %v726_v6  ;;  %v757_v9 = vpop.permute.xlu1 %756  ;;  %v862_v36 = vpack.c.bf16 %v744_v49, %v725_v10 }
 0x256   : > { %v761_v32 = vsel %vm760_vm11, %v757_v9, %v1724_v17  ;;  %v762_v44 = vsel %vm760_vm11, %v2583_v22, %v757_v9 }
 0x257   : > { %972 = vmatprep.subr.bf16.mxu0 %v862_v36  ;;  %1008 = vmatpush1.bf16.msra.mxu1 %v881_v53  ;;  %v870_v1 = vpack.c.bf16 %v780_v28, %v761_v32  ;;  %v738_v41 = vpop.permute.xlu0 %737  ;;  %v869_v31 = vpack.c.bf16 %v781_v62, %v762_v44  ;;  %v1227_v36 = vld [vmem:[%s3135_s7] sm:$0xff] }
 0x258   : > { %973 = vmatpush1.bf16.msra.mxu0 %v861_v20  ;;  %1009 = vmatprep.subr.bf16.mxu1 %v876_v16  ;;  %v742_v22 = vsel %vm741_vm14, %v738_v41, %v2632_v29 }
 0x259   : > { %v719_v57 = vpop.permute.xlu1 %718 }
 0x25a   : > { %v723_v17 = vsel %vm722_vm13, %v719_v57, %v2672_v27  ;;  %v724_v39 = vsel %vm722_vm13, %v1735_v7, %v719_v57  ;;  %v743_v27 = vsel %vm741_vm14, %v1740_v4, %v738_v41 }
 0x25b   : > { %1494 = vmatmul.mubr.msk.bf16.vlgmr.msra.gmra.mxu0 %vm521_vm9, %v889_v43  ;;  %1010 = vmatpush1.bf16.msra.mxu1 %v875_v3  ;;  %v864_v35 = vpack.c.bf16 %v742_v22, %v723_v17  ;;  %v863_v45 = vpack.c.bf16 %v743_v27, %v724_v39 }
 0x25c   : > { %1011 = vmatprep.subr.bf16.mxu1 %v870_v1  ;;  %1286 = vmatprep.mubr.bf16.mxu0 %v1949_v11 }
 0x25f   : > { %1012 = vmatpush1.bf16.msra.mxu1 %v869_v31 }
 0x260   : > { %1013 = vmatprep.subr.bf16.mxu1 %v864_v35 }
 0x263   : > { %1014 = vmatpush1.bf16.msra.mxu1 %v863_v45 }
 0x266   : > { %1496 = vmatmul.mubr.msk.bf16.vlgmr.msra.gmra.mxu1 %vm521_vm9, %v889_v43  ;;  %v894_v51 = vpop.permute.xlu1 %893 }
 0x267   : > { %1327 = vmatprep.mubr.bf16.mxu1 %v1949_v11 }
 0x312   : > { %v951_v47 = vpop.f32.mrf.mxu1 }
 0x313   : > { %v952_v21 = vadd.f32 %v951_v47, %v894_v51 }
 0x314   : > { %v953_v19 = vpop.f32.mrf.mxu1 }
 0x315   : > { %v1040_v29 = vmax.f32 %v952_v21, 0.0  ;;  %v954_v60 = vadd.f32 %v953_v19, %v894_v51 }
 0x316   : > { %v955_v12 = vpop.f32.mrf.mxu1 }
 0x317   : > { %v1041_v40 = vmax.f32 %v954_v60, 0.0  ;;  %v2769_v23 = vmul.f32 %v1040_v29, %v2424_v24 }
 0x318   : > { %v956_v54 = vpop.f32.mrf.mxu1 }
 0x319   : > { %v2772_v55 = vmul.f32 %v1041_v40, %v2426_v26 }
 0x31b   : > { %v992_v37 = vpop.f32.mrf.mxu0  ;;  %v1751_v59 = vpack.i.bf16 %v2772_v55, %v2769_v23 }
 0x31c   : > { %v993_v43 = vadd.f32 %v992_v37, %v894_v51 }
 0x31d   : > { %v994_v7 = vpop.f32.mrf.mxu0  ;;  %1752 = vrot.lane.b32.xlu1 %v1751_v59, %s1952_s15  ;;  %1742 = vrot.lane.b32.xlu0 %v1751_v59, %s1946_s10 }
 0x31e   : > { %v1042_v52 = vmax.f32 %v993_v43, 0.0  ;;  %v995_v8 = vadd.f32 %v994_v7, %v894_v51 }
 0x31f   : > { %v996_v42 = vpop.f32.mrf.mxu0 }
 0x320   : > { %v2779_v46 = vmul.f32 %v1042_v52, %v2437_v38  ;;  %v1043_v24 = vmax.f32 %v995_v8, 0.0 }
 0x321   : > { %v997_v0 = vpop.f32.mrf.mxu0  ;;  %1762 = vrot.lane.b32.xlu1 %v1751_v59, %s1953_s26  ;;  %1747 = vrot.lane.b32.xlu0 %v1751_v59, %s1954_s19 }
 0x322   : > { %v1771_v26 = vpack.i.bf16 %v2779_v46, %v2772_v55  ;;  %v2786_v4 = vmul.f32 %v1043_v24, %v2439_v48 }
 0x324   : > { %v1781_v38 = vpack.i.bf16 %v2786_v4, %v2779_v46  ;;  %v1791_v48 = vpack.i.bf16 %v2786_v4, %v2769_v23 }
 0x325   : > { %1772 = vrot.lane.b32.xlu1 %v1771_v26, %s1948_s21  ;;  %1757 = vrot.lane.b32.xlu0 %v1751_v59, %s1955_s20 }
 0x326   : > { %v1033_v30 = vpop.f32.mrf.mxu1 }
 0x327   : > { %v1034_v6 = vadd.f32 %v1033_v30, %v894_v51 }
 0x328   : > { %v1035_v2 = vpop.f32.mrf.mxu1 }
 0x329   : > { %1782 = vrot.lane.b32.xlu1 %v1781_v38, %s1946_s10  ;;  %1767 = vrot.lane.b32.xlu0 %v1771_v26, %s1951_s24  ;;  %v1044_v34 = vmax.f32 %v1034_v6, 0.0  ;;  %v1036_v61 = vadd.f32 %v1035_v2, %v894_v51 }
 0x32a   : > { %v1037_v63 = vpop.f32.mrf.mxu1 }
 0x32b   : > { %v2799_v49 = vmul.f32 %v1044_v34, %v2462_v25  ;;  %v1045_v53 = vmax.f32 %v1036_v61, 0.0 }
 0x32c   : > { %v1038_v10 = vpop.f32.mrf.mxu1 }
 0x32d   : > { %1792 = vrot.lane.b32.xlu1 %v1791_v48, %s1948_s21  ;;  %1777 = vrot.lane.b32.xlu0 %v1771_v26, %s1950_s22  ;;  %v2804_v20 = vmul.f32 %v1045_v53, %v2464_v50  ;;  %v1801_v9 = vpack.i.bf16 %v2799_v49, %v2786_v4 }
 0x32f   : > { %v1806_v25 = vpack.i.bf16 %v2779_v46, %v2804_v20  ;;  %v1821_v50 = vpack.i.bf16 %v2804_v20, %v2799_v49 }
 0x331   : > { %1797 = vrot.lane.b32.xlu1 %v1791_v48, %s1950_s22  ;;  %1787 = vrot.lane.b32.xlu0 %v1791_v48, %s1951_s24 }
 0x335   : > { %1116 = vrot.lane.b32.xlu1 %v2804_v20, %s1952_s15  ;;  %1802 = vrot.lane.b32.xlu0 %v1801_v9, %s1954_s19 }
 0x339   : > { %1080 = vrot.lane.b32.xlu1 %v2804_v20, %s1953_s26  ;;  %1807 = vrot.lane.b32.xlu0 %v1806_v25, %s1954_s19 }
 0x33d   : > { %1812 = vrot.lane.b32.xlu1 %v1781_v38, %s1952_s15  ;;  %1062 = vrot.lane.b32.xlu0 %v2804_v20, %s1955_s20 }
 0x341   : > { %1822 = vrot.lane.b32.xlu1 %v1821_v50, %s1951_s24  ;;  %1817 = vrot.lane.b32.xlu0 %v1821_v50, %s1946_s10 }
 0x345   : > { %1832 = vrot.lane.b32.xlu1 %v1821_v50, %s1950_s22  ;;  %1827 = vrot.lane.b32.xlu0 %v1821_v50, %s1948_s21  ;;  %s3080_s22 = scalar_lea.vmem [#allocation5], %s1508_s29  ;;  %s1509_s29 = smul.u32 768, %s2023_s9 }
 0x346   : > { %s1410_s24 = sshll.u32 %s3080_s22, 4  ;;  %s1396_s9 = scalar_lea.sflag [#allocation4], %s2088_s14  ;;  %s1411_s24 = int_to_ptr.vmem [resolvable:$true] %s1410_s24 }
 0x347   : > { %s1875_s18 = scalar_lea.vmem %s1411_s24, 768  ;;  %p1882_p1 = scmp.lt.s32.totalorder %s1411_s24, %s1880_s12 }
 0x348   : > { %p1876_p11 = scmp.ne.s32.totalorder %s1411_s24, %s1875_s18  ;;  %p1883_p3 = scmp.lt.s32.totalorder %s1881_s13, %s1875_s18 }
 0x349   : > { %1837 = vrot.lane.b32.xlu1 %v1781_v38, %s1955_s20  ;;  %1114 = vrot.lane.b32.xlu0 %v2799_v49, %s1952_s15 }
 0x34a   : > { %p1877_p13 = pnand %p1876_p11, %p3149_p12  ;;  %p1884_p8 = por %p1883_p3, %p1882_p1 }
 0x34c   : > { %p1878_p0 = pneg %p1877_p13 }
 0x34d   : > { %1842 = vrot.lane.b32.xlu1 %v1781_v38, %s1953_s26  ;;  %1060 = vrot.lane.b32.xlu0 %v2799_v49, %s1955_s20  ;;  %s1408_s20 = scalar_lea.hbm %s3136_s8, %s1509_s29 }
 0x34e   : > { %p1885_p10 = pnand %p1884_p8, %p1878_p0 }
 0x351   : > { %1230 = vperm.xlu1 %1655, %v1227_v36   ;;  %1078 = vrot.lane.b32.xlu0 %v2799_v49, %s1953_s26 }
 0x38f   : > { %v2836_v18 = vpop.permute.xlu1 %1752  ;;  %v2838_v16 = vpop.permute.xlu0 %1742 }
 0x390   : > { %v1745_v28 = vunpack.i.h.bf16 %v2838_v16  ;;  %v1744_v57 = vunpack.i.l.bf16 %v2838_v16  ;;  %v1755_v6 = vunpack.i.h.bf16 %v2836_v18  ;;  %v1754_v38 = vunpack.i.l.bf16 %v2836_v18 }
 0x392   : > { %v1194_v41 = vsel %vm401_vm4, %v1744_v57, %v1745_v28 }
 0x393   : > { %v2840_v32 = vpop.permute.xlu1 %1762  ;;  %v2842_v3 = vpop.permute.xlu0 %1747  ;;  %v1220_v45 = vpack.c.bf16 %v1194_v41, %v1194_v41 }
 0x394   : > { %v1750_v42 = vunpack.i.h.bf16 %v2842_v3  ;;  %v1749_v24 = vunpack.i.l.bf16 %v2842_v3  ;;  %v1765_v50 = vunpack.i.h.bf16 %v2840_v32  ;;  %v1764_v36 = vunpack.i.l.bf16 %v2840_v32 }
 0x395   : > { %v1237_v54 = vsel %vm525_vm3, %v1220_v45, 0 }
 0x396   : > { %v1104_v9 = vsel %vm760_vm11, %v1749_v24, %v1750_v42 }
 0x397   : > { %v2846_v44 = vpop.permute.xlu1 %1772  ;;  %v2848_v1 = vpop.permute.xlu0 %1757 }
 0x398   : > { %v1775_v17 = vunpack.i.h.bf16 %v2846_v44  ;;  %v1774_v22 = vunpack.i.l.bf16 %v2846_v44  ;;  %v1760_v10 = vunpack.i.h.bf16 %v2848_v1  ;;  %v1759_v53 = vunpack.i.l.bf16 %v2848_v1 }
 0x39a   : > { %v1175_v60 = vsel %vm382_vm7, %v1774_v22, %v1775_v17 }
 0x39b   : > { %v2855_v62 = vpop.permute.xlu1 %1782  ;;  %v2857_v31 = vpop.permute.xlu0 %1767 }
 0x39c   : > { %v1784_v39 = vunpack.i.l.bf16 %v2855_v62  ;;  %v1770_v35 = vunpack.i.h.bf16 %v2857_v31  ;;  %v1769_v27 = vunpack.i.l.bf16 %v2857_v31  ;;  %v1785_v25 = vunpack.i.h.bf16 %v2855_v62 }
 0x39d   : > { %v1068_v62 = vsel %vm722_vm13, %v1759_v53, %v1760_v10 }
 0x39e   : > { %v1193_v51 = vsel %vm401_vm4, %v1745_v28, %v1784_v39  ;;  %v1157_v47 = vsel %vm816_vm10, %v1769_v27, %v1770_v35 }
 0x39f   : > { %v1221_v21 = vpack.c.bf16 %v1193_v51, %v1193_v51  ;;  %v2869_v19 = vpop.permute.xlu1 %1792  ;;  %v2871_v29 = vpop.permute.xlu0 %1777  ;;  %v1215_v37 = vpack.c.bf16 %v1175_v60, %v1157_v47  ;;  %v1192_v47 = vsel %vm401_vm4, %v1784_v39, %v1785_v25 }
 0x3a0   : > { %v1780_v12 = vunpack.i.h.bf16 %v2871_v29  ;;  %v1779_v40 = vunpack.i.l.bf16 %v2871_v29  ;;  %v1794_v59 = vunpack.i.l.bf16 %v2869_v19 }
 0x3a1   : > { %1497 = vmatprep.subr.msk.bf16.mxu0 %vm525_vm3, %v1221_v21 }
 0x3a2   : > { %1261 = vmatpush1.bf16.msra.mxu0 %v1237_v54  ;;  %v1139_v0 = vsel %vm344_vm8, %v1779_v40, %v1780_v12  ;;  %v1176_v26 = vsel %vm382_vm7, %v1794_v59, %v1774_v22  ;;  %v1122_v22 = vsel %vm779_vm12, %v1754_v38, %v1755_v6  ;;  %v1086_v54 = vsel %vm741_vm14, %v1764_v36, %v1765_v50 }
 0x3a3   : > { %v2882_v43 = vpop.permute.xlu1 %1797  ;;  %v2884_v7 = vpop.permute.xlu0 %1787  ;;  %1262 = vmatprep.subr.bf16.mxu0 %v1215_v37  ;;  %v1209_v48 = vpack.c.bf16 %v1139_v0, %v2772_v55  ;;  %v1203_v45 = vpack.c.bf16 %v1122_v22, %v1104_v9  ;;  %v1197_v0 = vpack.c.bf16 %v1086_v54, %v1068_v62 }
 0x3a4   : > { %v1799_v52 = vunpack.i.l.bf16 %v2882_v43  ;;  %v1789_v8 = vunpack.i.l.bf16 %v2884_v7 }
 0x3a6   : > { %v1158_v30 = vsel %vm816_vm10, %v1789_v8, %v1769_v27  ;;  %v1140_v61 = vsel %vm344_vm8, %v1799_v52, %v1779_v40 }
 0x3a7   : > { %v1214_v2 = vpack.c.bf16 %v1176_v26, %v1158_v30  ;;  %v2904_v63 = vpop.permute.xlu1 %1116  ;;  %v2906_v34 = vpop.permute.xlu0 %1802  ;;  %v1208_v28 = vpack.c.bf16 %v1140_v61, %v2769_v23  ;;  %v1222_v26 = vpack.c.bf16 %v1192_v47, %v1192_v47  ;;  %v1800_v61 = vunpack.i.h.bf16 %v2882_v43 }
 0x3a8   : > { %v1123_v23 = vsel %vm779_vm12, %v2904_v63, %v1754_v38 }
 0x3a9   : > { %1263 = vmatpush1.bf16.msra.mxu0 %v1214_v2  ;;  %v1243_v22 = vsel %vm525_vm3, %v1222_v26, 0 }
 0x3aa   : > { %1264 = vmatprep.subr.bf16.mxu0 %v1209_v48  ;;  %v1790_v48 = vunpack.i.h.bf16 %v2884_v7 }
 0x3ab   : > { %v2923_v55 = vpop.permute.xlu1 %1080  ;;  %v2925_v41 = vpop.permute.xlu0 %1807 }
 0x3ac   : > { %v1809_v27 = vunpack.i.l.bf16 %v2925_v41  ;;  %v1087_v39 = vsel %vm741_vm14, %v2923_v55, %v1764_v36  ;;  %v2969_v36 = vld [vmem:[%s3134_s6] sm:$0xf]  ;;  %v1156_v16 = vsel %vm816_vm10, %v1770_v35, %v1790_v48 }
 0x3ad   : > { %1265 = vmatpush1.bf16.msra.mxu0 %v1208_v28 }
 0x3ae   : > { %v1105_v51 = vsel %vm760_vm11, %v1809_v27, %v1749_v24  ;;  %1266 = vmatprep.subr.bf16.mxu0 %v1203_v45  ;;  %v1795_v24 = vunpack.i.h.bf16 %v2869_v19 }
 0x3af   : > { %v1202_v21 = vpack.c.bf16 %v1123_v23, %v1105_v51  ;;  %v2945_v60 = vpop.permute.xlu1 %1812  ;;  %v2947_v40 = vpop.permute.xlu0 %1062 }
 0x3b0   : > { %v1069_v37 = vsel %vm722_vm13, %v2947_v40, %v1759_v53  ;;  %v1174_v53 = vsel %vm382_vm7, %v1775_v17, %v1795_v24  ;;  %v1815_v26 = vunpack.i.h.bf16 %v2945_v60 }
 0x3b1   : > { %1267 = vmatpush1.bf16.msra.mxu0 %v1202_v21  ;;  %v1196_v30 = vpack.c.bf16 %v1087_v39, %v1069_v37  ;;  %v1814_v39 = vunpack.i.l.bf16 %v2945_v60  ;;  %v1810_v60 = vunpack.i.h.bf16 %v2925_v41 }
 0x3b2   : > { %1268 = vmatprep.subr.bf16.mxu0 %v1197_v0  ;;  %v1138_v0 = vsel %vm344_vm8, %v1780_v12, %v1800_v61 }
 0x3b3   : > { %v1823_v38 = vpop.permute.xlu1 %1822  ;;  %v1818_v2 = vpop.permute.xlu0 %1817  ;;  %v1103_v18 = vsel %vm760_vm11, %v1750_v42, %v1810_v60 }
 0x3b4   : > { %v1820_v9 = vunpack.i.h.bf16 %v1818_v2  ;;  %v1819_v28 = vunpack.i.l.bf16 %v1818_v2  ;;  %v1824_v45 = vunpack.i.l.bf16 %v1823_v38  ;;  %v1825_v23 = vunpack.i.h.bf16 %v1823_v38 }
 0x3b5   : > { %1269 = vmatpush1.bf16.msra.mxu0 %v1196_v30 }
 0x3b6   : > { %v1191_v62 = vsel %vm401_vm4, %v1785_v25, %v1819_v28  ;;  %v1195_v44 = vsel %vm401_vm4, %v1820_v9, %v1744_v57  ;;  %v1190_v17 = vsel %vm401_vm4, %v1819_v28, %v1820_v9  ;;  %v1155_v12 = vsel %vm816_vm10, %v1790_v48, %v1824_v45 }
 0x3b7   : > { %v1223_v51 = vpack.c.bf16 %v1191_v62, %v1191_v62  ;;  %v1225_v47 = vpack.c.bf16 %v1195_v44, %v1195_v44  ;;  %v1833_v21 = vpop.permute.xlu1 %1832  ;;  %v1828_v54 = vpop.permute.xlu0 %1827  ;;  %v1224_v37 = vpack.c.bf16 %v1190_v17, %v1190_v17  ;;  %v1154_v2 = vsel %vm816_vm10, %v1824_v45, %v1825_v23 }
 0x3b8   : > { %v1830_v57 = vunpack.i.h.bf16 %v1828_v54  ;;  %v1829_v25 = vunpack.i.l.bf16 %v1828_v54  ;;  %1498 = vmatmul.mubr.msk.bf16.vlgmr.msra.gmra.mxu0 %vm521_vm9, %v2969_v36  ;;  %v1834_v30 = vunpack.i.l.bf16 %v1833_v21  ;;  %v1835_v31 = vunpack.i.h.bf16 %v1833_v21 }
 0x3b9   : > { %1499 = vmatprep.subr.msk.bf16.mxu1 %vm525_vm3, %v1223_v51  ;;  %1501 = vmatprep.subr.msk.bf16.mxu0 %vm525_vm3, %v1225_v47  ;;  %v1249_v29 = vsel %vm525_vm3, %v1224_v37, 0  ;;  %v1216_v44 = vpack.c.bf16 %v1174_v53, %v1156_v16  ;;  %v1210_v17 = vpack.c.bf16 %v1138_v0, %v2779_v46  ;;  %v1804_v45 = vunpack.i.l.bf16 %v2906_v34 }
 0x3ba   : > { %v1172_v35 = vsel %vm382_vm7, %v1829_v25, %v1830_v57  ;;  %1302 = vmatpush1.bf16.msra.mxu1 %v1243_v22  ;;  %1343 = vmatpush1.bf16.msra.mxu0 %v1249_v29  ;;  %v1173_v38 = vsel %vm382_vm7, %v1795_v24, %v1829_v25  ;;  %v1177_v22 = vsel %vm382_vm7, %v1830_v57, %v1794_v59  ;;  %v1805_v59 = vunpack.i.h.bf16 %v2906_v34 }
 0x3bb   : > { %v1838_v9 = vpop.permute.xlu1 %1837  ;;  %v1115_v28 = vpop.permute.xlu0 %1114  ;;  %v1217_v62 = vpack.c.bf16 %v1173_v38, %v1155_v12  ;;  %1368 = vmatprep.mubr.bf16.mxu0 %v1949_v11  ;;  %v1218_v48 = vpack.c.bf16 %v1172_v35, %v1154_v2  ;;  %v1159_v24 = vsel %vm816_vm10, %v1825_v23, %v1789_v8  ;;  %v1137_v19 = vsel %vm344_vm8, %v1800_v61, %v1834_v30 }
 0x3bc   : > { %v1219_v51 = vpack.c.bf16 %v1177_v22, %v1159_v24  ;;  %v1211_v11 = vpack.c.bf16 %v1137_v19, %v2786_v4  ;;  %v1141_v7 = vsel %vm344_vm8, %v1835_v31, %v1799_v52  ;;  %v1120_v46 = vsel %vm779_vm12, %v1814_v39, %v1815_v26 }
 0x3bd   : > { %1303 = vmatprep.subr.bf16.mxu1 %v1217_v62  ;;  %v1136_v8 = vsel %vm344_vm8, %v1834_v30, %v1835_v31  ;;  %v1840_v53 = vunpack.i.h.bf16 %v1838_v9  ;;  %v1213_v34 = vpack.c.bf16 %v1141_v7, %v2804_v20  ;;  %v1102_v4 = vsel %vm760_vm11, %v1810_v60, %v1804_v45 }
 0x3be   : > { %1304 = vmatpush1.bf16.msra.mxu1 %v1216_v44  ;;  %1344 = vmatprep.subr.bf16.mxu0 %v1219_v51  ;;  %v1839_v47 = vunpack.i.l.bf16 %v1838_v9  ;;  %v1118_v43 = vsel %vm779_vm12, %v1115_v28, %v2904_v63  ;;  %v1121_v54 = vsel %vm779_vm12, %v1755_v6, %v1814_v39  ;;  %v1205_v37 = vpack.c.bf16 %v1120_v46, %v1102_v4 }
 0x3bf   : > { %v1843_v23 = vpop.permute.xlu1 %1842  ;;  %v1061_v61 = vpop.permute.xlu0 %1060  ;;  %1345 = vmatpush1.bf16.msra.mxu0 %v1218_v48  ;;  %1305 = vmatprep.subr.bf16.mxu1 %v1211_v11  ;;  %v1212_v20 = vpack.c.bf16 %v1136_v8, %v2799_v49  ;;  %v1100_v0 = vsel %vm760_vm11, %v1805_v59, %v1809_v27  ;;  %v1119_v6 = vsel %vm779_vm12, %v1815_v26, %v1115_v28 }
 0x3c0   : > { %v1845_v52 = vunpack.i.h.bf16 %v1843_v23  ;;  %v1844_v21 = vunpack.i.l.bf16 %v1843_v23  ;;  %1346 = vmatprep.subr.bf16.mxu0 %v1213_v34  ;;  %v1207_v16 = vpack.c.bf16 %v1118_v43, %v1100_v0  ;;  %v1204_v49 = vpack.c.bf16 %v1121_v54, %v1103_v18 }
 0x3c1   : > { %v1064_v41 = vsel %vm722_vm13, %v1061_v61, %v2947_v40  ;;  %v1066_v3 = vsel %vm722_vm13, %v1839_v47, %v1840_v53  ;;  %v1101_v42 = vsel %vm760_vm11, %v1804_v45, %v1805_v59  ;;  %v1065_v32 = vsel %vm722_vm13, %v1840_v53, %v1061_v61 }
 0x3c2   : > { %1306 = vmatpush1.bf16.msra.mxu1 %v1210_v17  ;;  %v1084_v63 = vsel %vm741_vm14, %v1844_v21, %v1845_v52  ;;  %v1085_v25 = vsel %vm741_vm14, %v1765_v50, %v1844_v21  ;;  %v1206_v40 = vpack.c.bf16 %v1119_v6, %v1101_v42 }
 0x3c3   : > { %v1079_v57 = vpop.permute.xlu0 %1078  ;;  %1307 = vmatprep.subr.bf16.mxu1 %v1205_v37  ;;  %1347 = vmatpush1.bf16.msra.mxu0 %v1212_v20  ;;  %v1199_v39 = vpack.c.bf16 %v1084_v63, %v1066_v3 }
 0x3c4   : > { %v1082_v27 = vsel %vm741_vm14, %v1079_v57, %v2923_v55  ;;  %1348 = vmatprep.subr.bf16.mxu0 %v1207_v16  ;;  %v1067_v55 = vsel %vm722_vm13, %v1760_v10, %v1839_v47  ;;  %v1083_v30 = vsel %vm741_vm14, %v1845_v52, %v1079_v57 }
 0x3c5   : > { %v1201_v26 = vpack.c.bf16 %v1082_v27, %v1064_v41  ;;  %v1198_v29 = vpack.c.bf16 %v1085_v25, %v1067_v55  ;;  %v1200_v50 = vpack.c.bf16 %v1083_v30, %v1065_v32 }
 0x3c6   : > { %1308 = vmatpush1.bf16.msra.mxu1 %v1204_v49 }
 0x3c7   : > { %1309 = vmatprep.subr.bf16.mxu1 %v1199_v39  ;;  %1349 = vmatpush1.bf16.msra.mxu0 %v1206_v40 }
 0x3c8   : > { %1350 = vmatprep.subr.bf16.mxu0 %v1201_v26 }
 0x3ca   : > { %1310 = vmatpush1.bf16.msra.mxu1 %v1198_v29 }
 0x3cb   : > { %1351 = vmatpush1.bf16.msra.mxu0 %v1200_v50 }
 0x3cc   : > { %v1231_v1 = vpop.permute.xlu1 %1230 }
 0x3cd   : > { %1500 = vmatmul.mubr.msk.bf16.vlgmr.msra.gmra.mxu1 %vm521_vm9, %v2969_v36 }
 0x3ce   : > { %1502 = vmatmul.mubr.msk.bf16.vlgmr.msra.gmra.mxu0 %vm521_vm9, %v2969_v36 }
 0x478   : > { %v1288_v10 = vpop.f32.mrf.mxu0 }
 0x479   : > { %v1289_v31 = vadd.f32 %v1288_v10, %v1231_v1 }
 0x47a   : > { %v1290_v35 = vpop.f32.mrf.mxu0 }
 0x47b   : > { %v1377_v12 = vadd.f32 %v1289_v31, %v2429_v14  ;;  %v1291_v38 = vadd.f32 %v1290_v35, %v1231_v1 }
 0x47c   : > { %v1292_v15 = vpop.f32.mrf.mxu0 }
 0x47d   : > { %v1383_v60 = vmax.f32 %v1377_v12, 0.0  ;;  %v1378_v2 = vadd.f32 %v1291_v38, %v2432_v33 }
 0x47e   : > { %v1293_v9 = vpop.f32.mrf.mxu0 }
 0x47f   : > { %1389 = vst [vmem:[%s3080_s22] sm:$0xff] %v1383_v60  ;;  %v1384_v36 = vmax.f32 %v1378_v2, 0.0 }
 0x481   : > { %1390 = vst [vmem:[%s3080_s22 + $0x8] sm:$0xff] %v1384_v36 }
 0x48d   : > { %v1329_v28 = vpop.f32.mrf.mxu1 }
 0x48e   : > { %v1330_v62 = vadd.f32 %v1329_v28, %v1231_v1  ;;  %v1370_v14 = vpop.f32.mrf.mxu0 }
 0x48f   : > { %v1331_v22 = vpop.f32.mrf.mxu1  ;;  %v1371_v48 = vadd.f32 %v1370_v14, %v1231_v1 }
 0x490   : > { %v1379_v44 = vadd.f32 %v1330_v62, %v2442_v13  ;;  %v1332_v33 = vadd.f32 %v1331_v22, %v1231_v1  ;;  %v1372_v24 = vpop.f32.mrf.mxu0 }
 0x491   : > { %v1333_v17 = vpop.f32.mrf.mxu1  ;;  %v1381_v51 = vadd.f32 %v1371_v48, %v2470_v5  ;;  %v1373_v59 = vadd.f32 %v1372_v24, %v1231_v1 }
 0x492   : > { %v1385_v45 = vmax.f32 %v1379_v44, 0.0  ;;  %v1380_v19 = vadd.f32 %v1332_v33, %v2445_v56  ;;  %v1374_v11 = vpop.f32.mrf.mxu0 }
 0x493   : > { %v1334_v7 = vpop.f32.mrf.mxu1  ;;  %v1387_v13 = vmax.f32 %v1381_v51, 0.0  ;;  %v1382_v8 = vadd.f32 %v1373_v59, %v2473_v58 }
 0x494   : > { %1391 = vst [vmem:[%s3080_s22 + $0x10] sm:$0xff] %v1385_v45  ;;  %v1386_v46 = vmax.f32 %v1380_v19, 0.0  ;;  %v1375_v53 = vpop.f32.mrf.mxu0 }
 0x495   : > { %1393 = vst [vmem:[%s3080_s22 + $0x20] sm:$0xff] %v1387_v13  ;;  %v1388_v23 = vmax.f32 %v1382_v8, 0.0 }
 0x496   : > { %1392 = vst [vmem:[%s3080_s22 + $0x18] sm:$0xff] %v1386_v46 }
 0x497   : > { %1394 = vst [vmem:[%s3080_s22 + $0x28] sm:$0xff] %v1388_v23 }
 0x498   : > { %1888 = shalt.err (!%p1885_p10)
}
 0x499   : > { %s1889_s23 = scalar_lea.hbm %s1408_s20, 768  ;;  %s1893_s10 = scalar_lea.hbm %s3136_s8, 1536 }
 0x49a   : > { %p1890_p2 = scmp.ne.s32.totalorder %s1408_s20, %s1889_s23  ;;  %p1894_p7 = scmp.lt.s32.totalorder %s1408_s20, %s3136_s8 }
 0x49b   : > { %p1895_p5 = scmp.lt.s32.totalorder %s1893_s10, %s1889_s23 }
 0x49c   : > { %p1891_p4 = pnand %p1890_p2, %p3149_p12 }
 0x49d   : > { %p1896_p6 = por %p1895_p5, %p1894_p7 }
 0x49e   : > { %p1892_p9 = pneg %p1891_p4 }
 0x4a0   : > { %p1897_p11 = pnand %p1896_p6, %p1892_p9 }
 0x4a2   : > { %1900 = shalt.err (!%p1897_p11)
}
 0x4a3   : > { %1512 = dma.vmem_to_hbm [thread:$0]  (%p3149_p12), %s1411_s24, 768, %s1408_s20, %s1396_s9  }
 0x4a4 PF: > { %s1422_s29 = sand.u32 1, %s1927_s27   ;;  %p3150_p13 = scmp.ne.s32.totalorder %s3144_s17, 0 }
 0x4a5   : > { %p3151_p0 = scmp.ge.s32.totalorder %s1939_s30, 2  ;;  %s1423_s15 = scalar_lea.sflag [#allocation4], %s1422_s29 }
 0x4a7   : > { %p1519_p1 = pnand %p3151_p0, %p3150_p13 }
 0x4a9   : > { %p1520_p3 = pneg %p1519_p1 }
 0x4ab   : > { %1922 = dma.done.wait (%p1520_p3), %s1423_s15, 768  }
 0x4ac   : > { %1924 = vsyncadd (%p1520_p3), %s1423_s15, 4294966528  ;;  %s3152_s26 = sld [smem:[#allocation8_spill]]  ;;  %p21_p8 = scmp.ge.s32.totalorder %s2027_s11, 4  }
 0x4ad   : > { %s3153_s29 = sld [smem:[#allocation9_spill]]  ;;  %s3154_s27 = smov %s1931_s28 }
 0x4ae   : > { %s3156_s30 = smov %s2027_s11  ;;  %23 = sbr.rel (!%p21_p8) target bundleno = 5 (0x5), region = 97 }
 0x4b2   : > { %s3155_s28 = smov %s3152_s26 }
 0x4b3   :  { %1428 = vsyncpa [#allocation3], 1 }
 0x4b4   :  { %1430 = vsyncpa [#allocation3 + $0x1], 1 }
 0x4b5   :  { %1431 = vsyncpa [#allocation4], 1 }
 0x4b6   :  { %1433 = vsyncpa [#allocation4 + $0x1], 1 }

</bundles_post_ra>
